<compile_context>
chip_gen: v5e
topology: v5e:2x2
jax: 0.10.0
libtpu: 0.0.40
codegen_flags: <defaults>
</compile_context>

<pallas_src>
import functools
import math

import jax
import jax.numpy as jnp
from jax.experimental import pallas as pl
from jax.experimental.pallas import tpu as pltpu

VMEM = pl.BlockSpec(memory_space=pltpu.MemorySpace.VMEM)
_LANES = 128          # parameter-slab lane width / lane-dense output width
_SUBLANE = 8          # f32 sublane granularity for slab row padding

CFG = dict(
    pose_dim=69,          # 'body' pose, axis_angle, no jpos/jvel
    in_mlp_hdim=(128, 64),
    model_dim=32,
    nhead=4,
    ff_dim=64,
    nlayer=2,
    out_mlp_hdim=(64,),
    context_dim=16,
)


# --------------------------------- kernel -----------------------------------

def _layernorm(x, g, b, eps=1e-5):
    mu = jnp.mean(x, axis=-1, keepdims=True)
    xc = x - mu
    var = jnp.mean(xc * xc, axis=-1, keepdims=True)
    return xc * jax.lax.rsqrt(var + eps) * g + b


def _fused_ctx_encoder_kernel(x_ref, pe_ref, mask_ref, p_ref, o_ref, *,
                              offsets, cfg, B, T):
    E = cfg["model_dim"]
    H = cfg["nhead"]
    dh = E // H
    N = B * T

    # -- lazy, point-of-use loads from the packed parameter slab -------------
    def w(name):                              # static ref slice, load at use
        r0, nr, nc = offsets[name]
        return p_ref[r0:r0 + nr, :nc]

    def dense(x, name, act=None):
        y = jnp.dot(x, w(name + "_w"), preferred_element_type=jnp.float32)
        y = y + w(name + "_b")
        if act == "relu":
            y = jnp.maximum(y, 0.0)
        return y

    x = x_ref[...]                                            # (N, pose_dim)

    # in_mlp (ctx['mlp_htype'] == 'relu')
    for i in range(len(cfg["in_mlp_hdim"])):
        x = dense(x, f"in{i}", act="relu")

    # positional encoding (concat=True) fused by weight split:
    #   concat([x, pe]) @ W + b == x @ W_x + (pe @ W_pe + b)
    # the (pe @ W_pe + b) half arrives precomputed as pe_ref (N, E).
    x = jnp.dot(x, w("pe_wx"), preferred_element_type=jnp.float32) + pe_ref[...]

    # key-padding mask (1.0 => key ignored) -> additive -1e9, computed once
    # and broadcast to the head-folded batch dim (folded index = h*B + b).
    neg_b = (mask_ref[...] * (-1e9))[:, None, :]              # (B, 1, Tk)
    neg = jnp.concatenate([neg_b] * H, axis=0)                # (H*B, 1, Tk)

    # transformer encoder (post-norm, relu FFN, eval -> dropout no-op)
    for l in range(cfg["nlayer"]):
        pfx = f"l{l}_"
        # QKV projection; q columns pre-scaled by 1/sqrt(dh) at pack time
        qkv = dense(x, pfx + "att_in").reshape(B, T, 3 * E)   # (B, T, 3E)
        # fold heads into the LEADING batch dim -> 2 einsums for all heads
        q = jnp.concatenate(
            [qkv[:, :, h * dh:(h + 1) * dh] for h in range(H)], axis=0)
        k = jnp.concatenate(
            [qkv[:, :, E + h * dh:E + (h + 1) * dh] for h in range(H)], axis=0)
        v = jnp.concatenate(
            [qkv[:, :, 2 * E + h * dh:2 * E + (h + 1) * dh] for h in range(H)],
            axis=0)                                           # (H*B, T, dh)
        s = jnp.einsum("bqd,bkd->bqk", q, k,
                       preferred_element_type=jnp.float32) + neg
        m = jnp.max(s, axis=-1, keepdims=True)
        p = jnp.exp(s - m)
        p = p * pl.reciprocal(jnp.sum(p, axis=-1, keepdims=True), approx=True)
        a = jnp.einsum("bqk,bkd->bqd", p, v,
                       preferred_element_type=jnp.float32)    # (H*B, T, dh)
        att = jnp.concatenate(
            [a[h * B:(h + 1) * B] for h in range(H)], axis=-1)  # (B, T, E)
        att = dense(att.reshape(N, E), pfx + "att_out")
        x = _layernorm(x + att, w(pfx + "ln1_g"), w(pfx + "ln1_b"))
        ff = dense(x, pfx + "ff1", act="relu")
        ff = dense(ff, pfx + "ff2")
        x = _layernorm(x + ff, w(pfx + "ln2_g"), w(pfx + "ln2_b"))

    # out_mlp + final fc (fc padded to 128 lanes at pack time -> lane-dense
    # store below; the wrapper slices back to context_dim)
    for i in range(len(cfg["out_mlp_hdim"])):
        x = dense(x, f"out{i}", act="relu")
    o_ref[...] = dense(x, "fc").astype(o_ref.dtype)           # (N, 128)


# ------------------------------ params & packing ----------------------------

def sinusoidal_pe(T, d_model):
    pos = jnp.arange(T, dtype=jnp.float32)[:, None]
    div = jnp.exp(jnp.arange(0, d_model, 2, dtype=jnp.float32)
                  * (-math.log(10000.0) / d_model))
    pe = jnp.zeros((T, d_model), dtype=jnp.float32)
    pe = pe.at[:, 0::2].set(jnp.sin(pos * div))
    pe = pe.at[:, 1::2].set(jnp.cos(pos * div))
    return pe


def init_params(key, cfg):
    """Raw (unpacked) parameters, mirroring the PyTorch module structure."""
    def dense(k, din, dout, scale=0.05):
        w = scale * jax.random.normal(k, (din, dout), jnp.float32)
        b = jnp.zeros((1, dout), jnp.float32)
        return w, b

    E = cfg["model_dim"]
    keys = iter(jax.random.split(key, 64))
    p = {}

    d = cfg["pose_dim"]
    p["in_mlp"] = []
    for h in cfg["in_mlp_hdim"]:
        p["in_mlp"].append(dense(next(keys), d, h))
        d = h

    # pe_fc weight (d+E, E) stored pre-split: rows [:d] act on x, rows [d:]
    # act on the sinusoidal PE (algebraically identical to concat + fc).
    w_pe, b_pe = dense(next(keys), d + E, E)
    p["pe_wx"], p["pe_wp"], p["pe_b"] = w_pe[:d], w_pe[d:], b_pe

    p["layers"] = []
    for _ in range(cfg["nlayer"]):
        lyr = {}
        lyr["w_in"], lyr["b_in"] = dense(next(keys), E, 3 * E)     # QKV proj
        lyr["w_out"], lyr["b_out"] = dense(next(keys), E, E)       # out proj
        lyr["ln1_g"] = jnp.ones((1, E), jnp.float32)
        lyr["ln1_b"] = jnp.zeros((1, E), jnp.float32)
        lyr["w_ff1"], lyr["b_ff1"] = dense(next(keys), E, cfg["ff_dim"])
        lyr["w_ff2"], lyr["b_ff2"] = dense(next(keys), cfg["ff_dim"], E)
        lyr["ln2_g"] = jnp.ones((1, E), jnp.float32)
        lyr["ln2_b"] = jnp.zeros((1, E), jnp.float32)
        p["layers"].append(lyr)

    d = E
    p["out_mlp"] = []
    for h in cfg["out_mlp_hdim"]:
        p["out_mlp"].append(dense(next(keys), d, h))
        d = h
    p["fc_w"], p["fc_b"] = dense(next(keys), d, cfg["context_dim"])
    return p


def pack_params(params, cfg):
    """Pack every kernel-side parameter into ONE (rows, 128) f32 slab.

    Returns (packed, offsets): packed = {'slab', 'pe_wp', 'pe_b'} (pe_* are
    only used host-side to precompute the PE term); offsets maps
    name -> (row_offset, rows, cols) static ints used by the kernel.
    Also folds the 1/sqrt(head_dim) attention scale into W_q / b_q and
    zero-pads the final fc to 128 output lanes (lane-dense store).
    """
    E = cfg["model_dim"]
    sc = 1.0 / math.sqrt(E // cfg["nhead"])

    entries = []

    def add(name, arr):
        arr = jnp.asarray(arr, jnp.float32)
        if arr.ndim == 1:
            arr = arr[None, :]
        entries.append((name, arr))

    for i, (w, b) in enumerate(params["in_mlp"]):
        add(f"in{i}_w", w); add(f"in{i}_b", b)
    add("pe_wx", params["pe_wx"])
    for l, lyr in enumerate(params["layers"]):
        w_in = jnp.concatenate([lyr["w_in"][:, :E] * sc, lyr["w_in"][:, E:]], 1)
        b_in = jnp.concatenate([lyr["b_in"][:, :E] * sc, lyr["b_in"][:, E:]], 1)
        add(f"l{l}_att_in_w", w_in); add(f"l{l}_att_in_b", b_in)
        add(f"l{l}_att_out_w", lyr["w_out"]); add(f"l{l}_att_out_b", lyr["b_out"])
        add(f"l{l}_ln1_g", lyr["ln1_g"]); add(f"l{l}_ln1_b", lyr["ln1_b"])
        add(f"l{l}_ff1_w", lyr["w_ff1"]); add(f"l{l}_ff1_b", lyr["b_ff1"])
        add(f"l{l}_ff2_w", lyr["w_ff2"]); add(f"l{l}_ff2_b", lyr["b_ff2"])
        add(f"l{l}_ln2_g", lyr["ln2_g"]); add(f"l{l}_ln2_b", lyr["ln2_b"])
    for i, (w, b) in enumerate(params["out_mlp"]):
        add(f"out{i}_w", w); add(f"out{i}_b", b)
    cdim = cfg["context_dim"]
    fc_w = jnp.zeros((params["fc_w"].shape[0], _LANES), jnp.float32)
    fc_w = fc_w.at[:, :cdim].set(params["fc_w"])
    fc_b = jnp.zeros((1, _LANES), jnp.float32).at[:, :cdim].set(params["fc_b"])
    add("fc_w", fc_w); add("fc_b", fc_b)

    offsets, blocks, off = {}, [], 0
    for name, arr in entries:
        r, c = arr.shape
        rp = -(-r // _SUBLANE) * _SUBLANE            # pad rows to sublane mult
        blk = jnp.zeros((rp, _LANES), jnp.float32).at[:r, :c].set(arr)
        blocks.append(blk)
        offsets[name] = (off, r, c)
        off += rp
    packed = {"slab": jnp.concatenate(blocks, axis=0),
              "pe_wp": params["pe_wp"], "pe_b": params["pe_b"]}
    return packed, offsets


# ----------------------------------- wrapper ---------------------------------

def context_encoder_forward(packed, x_in, vis_frame_mask, *, offsets, cfg):
    """x_in: (T, B, pose_dim) time-major (PyTorch layout);
    vis_frame_mask: (B, T) bool, True = padded frame ignored as attention key.
    Returns data['context']: (T, B, context_dim).
    Outputs for padded frames are still computed (same as PyTorch)."""
    T, B, _ = x_in.shape
    E, cdim = cfg["model_dim"], cfg["context_dim"]
    N = B * T

    # all layout plumbing once, here (kernel keeps the (N, .) layout)
    x2d = jnp.transpose(x_in, (1, 0, 2)).reshape(N, -1)        # (N, pose_dim)
    pe_term = sinusoidal_pe(T, E) @ packed["pe_wp"] + packed["pe_b"]   # (T, E)
    pe_term = jnp.tile(pe_term, (B, 1))                        # (N, E), b-major
    mask_f = vis_frame_mask.astype(jnp.float32)                # (B, T)

    out = pl.pallas_call(
        functools.partial(_fused_ctx_encoder_kernel,
                          offsets=offsets, cfg=cfg, B=B, T=T),
        out_shape=jax.ShapeDtypeStruct((N, _LANES), jnp.float32),
        in_specs=[VMEM] * 4,
        out_specs=VMEM,
        # TODO(synk): at production B*T add a "parallel" row-grid axis
        # (megacore on v7x), size tiles for 64 MiB VMEM there (128 MiB on
        # v5e/v6e), set vmem_limit_bytes explicitly, and switch GEMM inputs to
        # bf16 on v6e/v7x; pure overhead at T=8, B=2.
    )(x2d, pe_term, mask_f, packed["slab"])

    ctx = out[:, :cdim].reshape(B, T, cdim)
    return jnp.transpose(ctx, (1, 0, 2))                       # (T, B, cdim)


# ----------------------- pure-JAX reference (self-check) ---------------------

def reference_forward(params, x_in, vis_frame_mask, cfg):
    E, H = cfg["model_dim"], cfg["nhead"]
    dh = E // H
    T, B, _ = x_in.shape
    x = jnp.transpose(x_in, (1, 0, 2)).reshape(B * T, -1)
    for w, b in params["in_mlp"]:
        x = jnp.maximum(x @ w + b, 0.0)
    pe = sinusoidal_pe(T, E)
    x = x @ params["pe_wx"] + jnp.tile(pe @ params["pe_wp"] + params["pe_b"],
                                       (B, 1))
    neg = (vis_frame_mask.astype(jnp.float32) * (-1e9))[:, None, None, :]
    for lyr in params["layers"]:
        qkv = (x @ lyr["w_in"] + lyr["b_in"]).reshape(B, T, 3, H, dh)
        q, k, v = qkv[:, :, 0] / math.sqrt(dh), qkv[:, :, 1], qkv[:, :, 2]
        s = jnp.einsum("bqhd,bkhd->bhqk", q, k) + neg
        p = jax.nn.softmax(s, axis=-1)
        a = jnp.einsum("bhqk,bkhd->bqhd", p, v).reshape(B * T, E)
        a = a @ lyr["w_out"] + lyr["b_out"]
        x = _layernorm(x + a, lyr["ln1_g"], lyr["ln1_b"])
        f = jnp.maximum(x @ lyr["w_ff1"] + lyr["b_ff1"], 0.0)
        f = f @ lyr["w_ff2"] + lyr["b_ff2"]
        x = _layernorm(x + f, lyr["ln2_g"], lyr["ln2_b"])
    for w, b in params["out_mlp"]:
        x = jnp.maximum(x @ w + b, 0.0)
    x = x @ params["fc_w"] + params["fc_b"]
    return jnp.transpose(x.reshape(B, T, -1), (1, 0, 2))


if __name__ == "__main__":
    key = jax.random.PRNGKey(0)
    kp, kx = jax.random.split(key)
    params = init_params(kp, CFG)
    packed, offsets = pack_params(params, CFG)

    T, B = 8, 2
    x_in = jax.random.normal(kx, (T, B, CFG["pose_dim"]), jnp.float32)
    # src_key_padding_mask semantics: True -> frame is ignored by attention
    vis_frame_mask = jnp.zeros((B, T), dtype=bool).at[1, -2:].set(True)

    fwd = jax.jit(functools.partial(context_encoder_forward,
                                    offsets=offsets, cfg=CFG))
    context = fwd(packed, x_in, vis_frame_mask)
    jax.block_until_ready(context)

    assert context.shape == (T, B, CFG["context_dim"])
    assert bool(jnp.all(jnp.isfinite(context)))
    ref = reference_forward(params, x_in, vis_frame_mask, CFG)
    # loose tolerance: pl.reciprocal(approx=True) + MXU vs XLA f32 precision
    assert bool(jnp.allclose(context, ref, atol=1e-2, rtol=1e-2)), (
        float(jnp.max(jnp.abs(context - ref))))
    print("KERNEL_OK")
</pallas_src>

<mosaic_0001>
module attributes {stable_mosaic.version = 11 : i64} {
  func.func @_fused_ctx_encoder_kernel(%arg0: memref<16x69xf32, #tpu.memory_space<vmem>>, %arg1: memref<16x32xf32, #tpu.memory_space<vmem>>, %arg2: memref<2x8xf32, #tpu.memory_space<vmem>>, %arg3: memref<840x128xf32, #tpu.memory_space<vmem>>, %arg4: memref<16x128xf32, #tpu.memory_space<vmem>>) attributes {dimension_semantics = [], scalar_prefetch = 0 : i64, scratch_operands = 0 : i64, tpu.core_type = #tpu.core_type<tc>} {
    %c0 = arith.constant 0 : index
    %c0_0 = arith.constant 0 : index
    %0 = vector.load %arg0[%c0, %c0_0] : memref<16x69xf32, #tpu.memory_space<vmem>>, vector<16x69xf32>
    %c0_1 = arith.constant 0 : index
    %c0_2 = arith.constant 0 : index
    %1 = vector.load %arg3[%c0_1, %c0_2] : memref<840x128xf32, #tpu.memory_space<vmem>>, vector<69x128xf32>
    %cst = arith.constant dense<0.000000e+00> : vector<16x128xf32>
    %2 = tpu.matmul %0, %1, %cst {dimension_numbers = #tpu.dot_dimension_numbers<[1], [0], [0], [1], [0, 0, 1, 1], [], []>} : vector<16x69xf32>, vector<69x128xf32>, vector<16x128xf32> -> vector<16x128xf32>
    %c72 = arith.constant 72 : index
    %c0_3 = arith.constant 0 : index
    %3 = vector.load %arg3[%c72, %c0_3] : memref<840x128xf32, #tpu.memory_space<vmem>>, vector<1x128xf32>
    %4 = vector.broadcast %3 : vector<1x128xf32> to vector<16x128xf32>
    %5 = arith.addf %2, %4 : vector<16x128xf32>
    %cst_4 = arith.constant 0.000000e+00 : f32
    %6 = vector.broadcast %cst_4 : f32 to vector<16x128xf32>
    %7 = arith.maximumf %5, %6 : vector<16x128xf32>
    %c80 = arith.constant 80 : index
    %c0_5 = arith.constant 0 : index
    %8 = vector.load %arg3[%c80, %c0_5] : memref<840x128xf32, #tpu.memory_space<vmem>>, vector<128x64xf32>
    %cst_6 = arith.constant dense<0.000000e+00> : vector<16x64xf32>
    %9 = tpu.matmul %7, %8, %cst_6 {dimension_numbers = #tpu.dot_dimension_numbers<[1], [0], [0], [1], [0, 0, 1, 1], [], []>} : vector<16x128xf32>, vector<128x64xf32>, vector<16x64xf32> -> vector<16x64xf32>
    %c208 = arith.constant 208 : index
    %c0_7 = arith.constant 0 : index
    %10 = vector.load %arg3[%c208, %c0_7] : memref<840x128xf32, #tpu.memory_space<vmem>>, vector<1x64xf32>
    %11 = vector.broadcast %10 : vector<1x64xf32> to vector<16x64xf32>
    %12 = arith.addf %9, %11 : vector<16x64xf32>
    %cst_8 = arith.constant 0.000000e+00 : f32
    %13 = vector.broadcast %cst_8 : f32 to vector<16x64xf32>
    %14 = arith.maximumf %12, %13 : vector<16x64xf32>
    %c216 = arith.constant 216 : index
    %c0_9 = arith.constant 0 : index
    %15 = vector.load %arg3[%c216, %c0_9] : memref<840x128xf32, #tpu.memory_space<vmem>>, vector<64x32xf32>
    %cst_10 = arith.constant dense<0.000000e+00> : vector<16x32xf32>
    %16 = tpu.matmul %14, %15, %cst_10 {dimension_numbers = #tpu.dot_dimension_numbers<[1], [0], [0], [1], [0, 0, 1, 1], [], []>} : vector<16x64xf32>, vector<64x32xf32>, vector<16x32xf32> -> vector<16x32xf32>
    %c0_11 = arith.constant 0 : index
    %c0_12 = arith.constant 0 : index
    %17 = vector.load %arg1[%c0_11, %c0_12] : memref<16x32xf32, #tpu.memory_space<vmem>>, vector<16x32xf32>
    %18 = arith.addf %16, %17 : vector<16x32xf32>
    %c0_13 = arith.constant 0 : index
    %c0_14 = arith.constant 0 : index
    %19 = vector.load %arg2[%c0_13, %c0_14] : memref<2x8xf32, #tpu.memory_space<vmem>>, vector<2x8xf32>
    %cst_15 = arith.constant -1.000000e+09 : f32
    %20 = vector.broadcast %cst_15 : f32 to vector<2x8xf32>
    %21 = arith.mulf %19, %20 : vector<2x8xf32>
    %22 = vector.shape_cast %21 : vector<2x8xf32> to vector<2x1x8xf32>
    %23 = tpu.concatenate %22, %22, %22, %22 in 0 : vector<2x1x8xf32>, vector<2x1x8xf32>, vector<2x1x8xf32>, vector<2x1x8xf32> -> vector<8x1x8xf32>
    %c280 = arith.constant 280 : index
    %c0_16 = arith.constant 0 : index
    %24 = vector.load %arg3[%c280, %c0_16] : memref<840x128xf32, #tpu.memory_space<vmem>>, vector<32x96xf32>
    %cst_17 = arith.constant dense<0.000000e+00> : vector<16x96xf32>
    %25 = tpu.matmul %18, %24, %cst_17 {dimension_numbers = #tpu.dot_dimension_numbers<[1], [0], [0], [1], [0, 0, 1, 1], [], []>} : vector<16x32xf32>, vector<32x96xf32>, vector<16x96xf32> -> vector<16x96xf32>
    %c312 = arith.constant 312 : index
    %c0_18 = arith.constant 0 : index
    %26 = vector.load %arg3[%c312, %c0_18] : memref<840x128xf32, #tpu.memory_space<vmem>>, vector<1x96xf32>
    %27 = vector.broadcast %26 : vector<1x96xf32> to vector<16x96xf32>
    %28 = arith.addf %25, %27 : vector<16x96xf32>
    %29 = vector.shape_cast %28 : vector<16x96xf32> to vector<2x8x96xf32>
    %30 = vector.extract_strided_slice %29 {offsets = [0, 0, 0], sizes = [2, 8, 8], strides = [1, 1, 1]} : vector<2x8x96xf32> to vector<2x8x8xf32>
    %31 = vector.extract_strided_slice %29 {offsets = [0, 0, 8], sizes = [2, 8, 8], strides = [1, 1, 1]} : vector<2x8x96xf32> to vector<2x8x8xf32>
    %32 = vector.extract_strided_slice %29 {offsets = [0, 0, 16], sizes = [2, 8, 8], strides = [1, 1, 1]} : vector<2x8x96xf32> to vector<2x8x8xf32>
    %33 = vector.extract_strided_slice %29 {offsets = [0, 0, 24], sizes = [2, 8, 8], strides = [1, 1, 1]} : vector<2x8x96xf32> to vector<2x8x8xf32>
    %34 = tpu.concatenate %30, %31, %32, %33 in 0 : vector<2x8x8xf32>, vector<2x8x8xf32>, vector<2x8x8xf32>, vector<2x8x8xf32> -> vector<8x8x8xf32>
    %35 = vector.extract_strided_slice %29 {offsets = [0, 0, 32], sizes = [2, 8, 8], strides = [1, 1, 1]} : vector<2x8x96xf32> to vector<2x8x8xf32>
    %36 = vector.extract_strided_slice %29 {offsets = [0, 0, 40], sizes = [2, 8, 8], strides = [1, 1, 1]} : vector<2x8x96xf32> to vector<2x8x8xf32>
    %37 = vector.extract_strided_slice %29 {offsets = [0, 0, 48], sizes = [2, 8, 8], strides = [1, 1, 1]} : vector<2x8x96xf32> to vector<2x8x8xf32>
    %38 = vector.extract_strided_slice %29 {offsets = [0, 0, 56], sizes = [2, 8, 8], strides = [1, 1, 1]} : vector<2x8x96xf32> to vector<2x8x8xf32>
    %39 = tpu.concatenate %35, %36, %37, %38 in 0 : vector<2x8x8xf32>, vector<2x8x8xf32>, vector<2x8x8xf32>, vector<2x8x8xf32> -> vector<8x8x8xf32>
    %40 = vector.extract_strided_slice %29 {offsets = [0, 0, 64], sizes = [2, 8, 8], strides = [1, 1, 1]} : vector<2x8x96xf32> to vector<2x8x8xf32>
    %41 = vector.extract_strided_slice %29 {offsets = [0, 0, 72], sizes = [2, 8, 8], strides = [1, 1, 1]} : vector<2x8x96xf32> to vector<2x8x8xf32>
    %42 = vector.extract_strided_slice %29 {offsets = [0, 0, 80], sizes = [2, 8, 8], strides = [1, 1, 1]} : vector<2x8x96xf32> to vector<2x8x8xf32>
    %43 = vector.extract_strided_slice %29 {offsets = [0, 0, 88], sizes = [2, 8, 8], strides = [1, 1, 1]} : vector<2x8x96xf32> to vector<2x8x8xf32>
    %44 = tpu.concatenate %40, %41, %42, %43 in 0 : vector<2x8x8xf32>, vector<2x8x8xf32>, vector<2x8x8xf32>, vector<2x8x8xf32> -> vector<8x8x8xf32>
    "tpu.trace_start"() <{level = 10 : i32, message = "bqd,bkd->bqk"}> : () -> ()
    %cst_19 = arith.constant dense<0.000000e+00> : vector<8x8x8xf32>
    %45 = tpu.matmul %34, %39, %cst_19 {dimension_numbers = #tpu.dot_dimension_numbers<[2], [2], [1], [1], [0, 0, 0, 1, 1, 1], [0], [0]>} : vector<8x8x8xf32>, vector<8x8x8xf32>, vector<8x8x8xf32> -> vector<8x8x8xf32>
    "tpu.trace_stop"() : () -> ()
    %46 = vector.broadcast %23 : vector<8x1x8xf32> to vector<8x8x8xf32>
    %47 = arith.addf %45, %46 : vector<8x8x8xf32>
    %cst_20 = arith.constant dense<0xFF800000> : vector<8x8xf32>
    %48 = vector.multi_reduction <maximumf>, %47, %cst_20 [2] : vector<8x8x8xf32> to vector<8x8xf32>
    %49 = vector.shape_cast %48 : vector<8x8xf32> to vector<8x8x1xf32>
    %50 = vector.broadcast %49 : vector<8x8x1xf32> to vector<8x8x8xf32>
    %51 = arith.subf %47, %50 : vector<8x8x8xf32>
    %52 = math.exp %51 : vector<8x8x8xf32>
    %cst_21 = arith.constant dense<0.000000e+00> : vector<8x8xf32>
    %53 = vector.multi_reduction <add>, %52, %cst_21 [2] : vector<8x8x8xf32> to vector<8x8xf32>
    %54 = vector.shape_cast %53 : vector<8x8xf32> to vector<8x8x1xf32>
    %55 = tpu.reciprocal %54 {approx = true} : vector<8x8x1xf32> -> vector<8x8x1xf32>
    %56 = vector.broadcast %55 : vector<8x8x1xf32> to vector<8x8x8xf32>
    %57 = arith.mulf %52, %56 : vector<8x8x8xf32>
    "tpu.trace_start"() <{level = 10 : i32, message = "bqk,bkd->bqd"}> : () -> ()
    %cst_22 = arith.constant dense<0.000000e+00> : vector<8x8x8xf32>
    %58 = tpu.matmul %57, %44, %cst_22 {dimension_numbers = #tpu.dot_dimension_numbers<[2], [1], [1], [2], [0, 0, 0, 1, 1, 2], [0], [0]>} : vector<8x8x8xf32>, vector<8x8x8xf32>, vector<8x8x8xf32> -> vector<8x8x8xf32>
    "tpu.trace_stop"() : () -> ()
    %59 = vector.extract_strided_slice %58 {offsets = [0, 0, 0], sizes = [2, 8, 8], strides = [1, 1, 1]} : vector<8x8x8xf32> to vector<2x8x8xf32>
    %60 = vector.extract_strided_slice %58 {offsets = [2, 0, 0], sizes = [2, 8, 8], strides = [1, 1, 1]} : vector<8x8x8xf32> to vector<2x8x8xf32>
    %61 = vector.extract_strided_slice %58 {offsets = [4, 0, 0], sizes = [2, 8, 8], strides = [1, 1, 1]} : vector<8x8x8xf32> to vector<2x8x8xf32>
    %62 = vector.extract_strided_slice %58 {offsets = [6, 0, 0], sizes = [2, 8, 8], strides = [1, 1, 1]} : vector<8x8x8xf32> to vector<2x8x8xf32>
    %63 = tpu.concatenate %59, %60, %61, %62 in 2 : vector<2x8x8xf32>, vector<2x8x8xf32>, vector<2x8x8xf32>, vector<2x8x8xf32> -> vector<2x8x32xf32>
    %64 = vector.shape_cast %63 : vector<2x8x32xf32> to vector<16x32xf32>
    %c320 = arith.constant 320 : index
    %c0_23 = arith.constant 0 : index
    %65 = vector.load %arg3[%c320, %c0_23] : memref<840x128xf32, #tpu.memory_space<vmem>>, vector<32x32xf32>
    %cst_24 = arith.constant dense<0.000000e+00> : vector<16x32xf32>
    %66 = tpu.matmul %64, %65, %cst_24 {dimension_numbers = #tpu.dot_dimension_numbers<[1], [0], [0], [1], [0, 0, 1, 1], [], []>} : vector<16x32xf32>, vector<32x32xf32>, vector<16x32xf32> -> vector<16x32xf32>
    %c352 = arith.constant 352 : index
    %c0_25 = arith.constant 0 : index
    %67 = vector.load %arg3[%c352, %c0_25] : memref<840x128xf32, #tpu.memory_space<vmem>>, vector<1x32xf32>
    %68 = vector.broadcast %67 : vector<1x32xf32> to vector<16x32xf32>
    %69 = arith.addf %66, %68 : vector<16x32xf32>
    %70 = arith.addf %18, %69 : vector<16x32xf32>
    %c360 = arith.constant 360 : index
    %c0_26 = arith.constant 0 : index
    %71 = vector.load %arg3[%c360, %c0_26] : memref<840x128xf32, #tpu.memory_space<vmem>>, vector<1x32xf32>
    %c368 = arith.constant 368 : index
    %c0_27 = arith.constant 0 : index
    %72 = vector.load %arg3[%c368, %c0_27] : memref<840x128xf32, #tpu.memory_space<vmem>>, vector<1x32xf32>
    %cst_28 = arith.constant dense<0.000000e+00> : vector<16xf32>
    %73 = vector.multi_reduction <add>, %70, %cst_28 [1] : vector<16x32xf32> to vector<16xf32>
    %74 = vector.shape_cast %73 : vector<16xf32> to vector<16x1xf32>
    %cst_29 = arith.constant 3.200000e+01 : f32
    %75 = vector.broadcast %cst_29 : f32 to vector<16x1xf32>
    %76 = arith.divf %74, %75 : vector<16x1xf32>
    %77 = vector.broadcast %76 : vector<16x1xf32> to vector<16x32xf32>
    %78 = arith.subf %70, %77 : vector<16x32xf32>
    %79 = arith.mulf %78, %78 : vector<16x32xf32>
    %cst_30 = arith.constant dense<0.000000e+00> : vector<16xf32>
    %80 = vector.multi_reduction <add>, %79, %cst_30 [1] : vector<16x32xf32> to vector<16xf32>
    %81 = vector.shape_cast %80 : vector<16xf32> to vector<16x1xf32>
    %cst_31 = arith.constant 3.200000e+01 : f32
    %82 = vector.broadcast %cst_31 : f32 to vector<16x1xf32>
    %83 = arith.divf %81, %82 : vector<16x1xf32>
    %cst_32 = arith.constant 9.99999974E-6 : f32
    %84 = vector.broadcast %cst_32 : f32 to vector<16x1xf32>
    %85 = arith.addf %83, %84 : vector<16x1xf32>
    %86 = math.rsqrt %85 : vector<16x1xf32>
    %87 = vector.broadcast %86 : vector<16x1xf32> to vector<16x32xf32>
    %88 = arith.mulf %78, %87 : vector<16x32xf32>
    %89 = vector.broadcast %71 : vector<1x32xf32> to vector<16x32xf32>
    %90 = arith.mulf %88, %89 : vector<16x32xf32>
    %91 = vector.broadcast %72 : vector<1x32xf32> to vector<16x32xf32>
    %92 = arith.addf %90, %91 : vector<16x32xf32>
    %c376 = arith.constant 376 : index
    %c0_33 = arith.constant 0 : index
    %93 = vector.load %arg3[%c376, %c0_33] : memref<840x128xf32, #tpu.memory_space<vmem>>, vector<32x64xf32>
    %cst_34 = arith.constant dense<0.000000e+00> : vector<16x64xf32>
    %94 = tpu.matmul %92, %93, %cst_34 {dimension_numbers = #tpu.dot_dimension_numbers<[1], [0], [0], [1], [0, 0, 1, 1], [], []>} : vector<16x32xf32>, vector<32x64xf32>, vector<16x64xf32> -> vector<16x64xf32>
    %c408 = arith.constant 408 : index
    %c0_35 = arith.constant 0 : index
    %95 = vector.load %arg3[%c408, %c0_35] : memref<840x128xf32, #tpu.memory_space<vmem>>, vector<1x64xf32>
    %96 = vector.broadcast %95 : vector<1x64xf32> to vector<16x64xf32>
    %97 = arith.addf %94, %96 : vector<16x64xf32>
    %cst_36 = arith.constant 0.000000e+00 : f32
    %98 = vector.broadcast %cst_36 : f32 to vector<16x64xf32>
    %99 = arith.maximumf %97, %98 : vector<16x64xf32>
    %c416 = arith.constant 416 : index
    %c0_37 = arith.constant 0 : index
    %100 = vector.load %arg3[%c416, %c0_37] : memref<840x128xf32, #tpu.memory_space<vmem>>, vector<64x32xf32>
    %cst_38 = arith.constant dense<0.000000e+00> : vector<16x32xf32>
    %101 = tpu.matmul %99, %100, %cst_38 {dimension_numbers = #tpu.dot_dimension_numbers<[1], [0], [0], [1], [0, 0, 1, 1], [], []>} : vector<16x64xf32>, vector<64x32xf32>, vector<16x32xf32> -> vector<16x32xf32>
    %c480 = arith.constant 480 : index
    %c0_39 = arith.constant 0 : index
    %102 = vector.load %arg3[%c480, %c0_39] : memref<840x128xf32, #tpu.memory_space<vmem>>, vector<1x32xf32>
    %103 = vector.broadcast %102 : vector<1x32xf32> to vector<16x32xf32>
    %104 = arith.addf %101, %103 : vector<16x32xf32>
    %105 = arith.addf %92, %104 : vector<16x32xf32>
    %c488 = arith.constant 488 : index
    %c0_40 = arith.constant 0 : index
    %106 = vector.load %arg3[%c488, %c0_40] : memref<840x128xf32, #tpu.memory_space<vmem>>, vector<1x32xf32>
    %c496 = arith.constant 496 : index
    %c0_41 = arith.constant 0 : index
    %107 = vector.load %arg3[%c496, %c0_41] : memref<840x128xf32, #tpu.memory_space<vmem>>, vector<1x32xf32>
    %cst_42 = arith.constant dense<0.000000e+00> : vector<16xf32>
    %108 = vector.multi_reduction <add>, %105, %cst_42 [1] : vector<16x32xf32> to vector<16xf32>
    %109 = vector.shape_cast %108 : vector<16xf32> to vector<16x1xf32>
    %cst_43 = arith.constant 3.200000e+01 : f32
    %110 = vector.broadcast %cst_43 : f32 to vector<16x1xf32>
    %111 = arith.divf %109, %110 : vector<16x1xf32>
    %112 = vector.broadcast %111 : vector<16x1xf32> to vector<16x32xf32>
    %113 = arith.subf %105, %112 : vector<16x32xf32>
    %114 = arith.mulf %113, %113 : vector<16x32xf32>
    %cst_44 = arith.constant dense<0.000000e+00> : vector<16xf32>
    %115 = vector.multi_reduction <add>, %114, %cst_44 [1] : vector<16x32xf32> to vector<16xf32>
    %116 = vector.shape_cast %115 : vector<16xf32> to vector<16x1xf32>
    %cst_45 = arith.constant 3.200000e+01 : f32
    %117 = vector.broadcast %cst_45 : f32 to vector<16x1xf32>
    %118 = arith.divf %116, %117 : vector<16x1xf32>
    %cst_46 = arith.constant 9.99999974E-6 : f32
    %119 = vector.broadcast %cst_46 : f32 to vector<16x1xf32>
    %120 = arith.addf %118, %119 : vector<16x1xf32>
    %121 = math.rsqrt %120 : vector<16x1xf32>
    %122 = vector.broadcast %121 : vector<16x1xf32> to vector<16x32xf32>
    %123 = arith.mulf %113, %122 : vector<16x32xf32>
    %124 = vector.broadcast %106 : vector<1x32xf32> to vector<16x32xf32>
    %125 = arith.mulf %123, %124 : vector<16x32xf32>
    %126 = vector.broadcast %107 : vector<1x32xf32> to vector<16x32xf32>
    %127 = arith.addf %125, %126 : vector<16x32xf32>
    %c504 = arith.constant 504 : index
    %c0_47 = arith.constant 0 : index
    %128 = vector.load %arg3[%c504, %c0_47] : memref<840x128xf32, #tpu.memory_space<vmem>>, vector<32x96xf32>
    %cst_48 = arith.constant dense<0.000000e+00> : vector<16x96xf32>
    %129 = tpu.matmul %127, %128, %cst_48 {dimension_numbers = #tpu.dot_dimension_numbers<[1], [0], [0], [1], [0, 0, 1, 1], [], []>} : vector<16x32xf32>, vector<32x96xf32>, vector<16x96xf32> -> vector<16x96xf32>
    %c536 = arith.constant 536 : index
    %c0_49 = arith.constant 0 : index
    %130 = vector.load %arg3[%c536, %c0_49] : memref<840x128xf32, #tpu.memory_space<vmem>>, vector<1x96xf32>
    %131 = vector.broadcast %130 : vector<1x96xf32> to vector<16x96xf32>
    %132 = arith.addf %129, %131 : vector<16x96xf32>
    %133 = vector.shape_cast %132 : vector<16x96xf32> to vector<2x8x96xf32>
    %134 = vector.extract_strided_slice %133 {offsets = [0, 0, 0], sizes = [2, 8, 8], strides = [1, 1, 1]} : vector<2x8x96xf32> to vector<2x8x8xf32>
    %135 = vector.extract_strided_slice %133 {offsets = [0, 0, 8], sizes = [2, 8, 8], strides = [1, 1, 1]} : vector<2x8x96xf32> to vector<2x8x8xf32>
    %136 = vector.extract_strided_slice %133 {offsets = [0, 0, 16], sizes = [2, 8, 8], strides = [1, 1, 1]} : vector<2x8x96xf32> to vector<2x8x8xf32>
    %137 = vector.extract_strided_slice %133 {offsets = [0, 0, 24], sizes = [2, 8, 8], strides = [1, 1, 1]} : vector<2x8x96xf32> to vector<2x8x8xf32>
    %138 = tpu.concatenate %134, %135, %136, %137 in 0 : vector<2x8x8xf32>, vector<2x8x8xf32>, vector<2x8x8xf32>, vector<2x8x8xf32> -> vector<8x8x8xf32>
    %139 = vector.extract_strided_slice %133 {offsets = [0, 0, 32], sizes = [2, 8, 8], strides = [1, 1, 1]} : vector<2x8x96xf32> to vector<2x8x8xf32>
    %140 = vector.extract_strided_slice %133 {offsets = [0, 0, 40], sizes = [2, 8, 8], strides = [1, 1, 1]} : vector<2x8x96xf32> to vector<2x8x8xf32>
    %141 = vector.extract_strided_slice %133 {offsets = [0, 0, 48], sizes = [2, 8, 8], strides = [1, 1, 1]} : vector<2x8x96xf32> to vector<2x8x8xf32>
    %142 = vector.extract_strided_slice %133 {offsets = [0, 0, 56], sizes = [2, 8, 8], strides = [1, 1, 1]} : vector<2x8x96xf32> to vector<2x8x8xf32>
    %143 = tpu.concatenate %139, %140, %141, %142 in 0 : vector<2x8x8xf32>, vector<2x8x8xf32>, vector<2x8x8xf32>, vector<2x8x8xf32> -> vector<8x8x8xf32>
    %144 = vector.extract_strided_slice %133 {offsets = [0, 0, 64], sizes = [2, 8, 8], strides = [1, 1, 1]} : vector<2x8x96xf32> to vector<2x8x8xf32>
    %145 = vector.extract_strided_slice %133 {offsets = [0, 0, 72], sizes = [2, 8, 8], strides = [1, 1, 1]} : vector<2x8x96xf32> to vector<2x8x8xf32>
    %146 = vector.extract_strided_slice %133 {offsets = [0, 0, 80], sizes = [2, 8, 8], strides = [1, 1, 1]} : vector<2x8x96xf32> to vector<2x8x8xf32>
    %147 = vector.extract_strided_slice %133 {offsets = [0, 0, 88], sizes = [2, 8, 8], strides = [1, 1, 1]} : vector<2x8x96xf32> to vector<2x8x8xf32>
    %148 = tpu.concatenate %144, %145, %146, %147 in 0 : vector<2x8x8xf32>, vector<2x8x8xf32>, vector<2x8x8xf32>, vector<2x8x8xf32> -> vector<8x8x8xf32>
    "tpu.trace_start"() <{level = 10 : i32, message = "bqd,bkd->bqk"}> : () -> ()
    %cst_50 = arith.constant dense<0.000000e+00> : vector<8x8x8xf32>
    %149 = tpu.matmul %138, %143, %cst_50 {dimension_numbers = #tpu.dot_dimension_numbers<[2], [2], [1], [1], [0, 0, 0, 1, 1, 1], [0], [0]>} : vector<8x8x8xf32>, vector<8x8x8xf32>, vector<8x8x8xf32> -> vector<8x8x8xf32>
    "tpu.trace_stop"() : () -> ()
    %150 = vector.broadcast %23 : vector<8x1x8xf32> to vector<8x8x8xf32>
    %151 = arith.addf %149, %150 : vector<8x8x8xf32>
    %cst_51 = arith.constant dense<0xFF800000> : vector<8x8xf32>
    %152 = vector.multi_reduction <maximumf>, %151, %cst_51 [2] : vector<8x8x8xf32> to vector<8x8xf32>
    %153 = vector.shape_cast %152 : vector<8x8xf32> to vector<8x8x1xf32>
    %154 = vector.broadcast %153 : vector<8x8x1xf32> to vector<8x8x8xf32>
    %155 = arith.subf %151, %154 : vector<8x8x8xf32>
    %156 = math.exp %155 : vector<8x8x8xf32>
    %cst_52 = arith.constant dense<0.000000e+00> : vector<8x8xf32>
    %157 = vector.multi_reduction <add>, %156, %cst_52 [2] : vector<8x8x8xf32> to vector<8x8xf32>
    %158 = vector.shape_cast %157 : vector<8x8xf32> to vector<8x8x1xf32>
    %159 = tpu.reciprocal %158 {approx = true} : vector<8x8x1xf32> -> vector<8x8x1xf32>
    %160 = vector.broadcast %159 : vector<8x8x1xf32> to vector<8x8x8xf32>
    %161 = arith.mulf %156, %160 : vector<8x8x8xf32>
    "tpu.trace_start"() <{level = 10 : i32, message = "bqk,bkd->bqd"}> : () -> ()
    %cst_53 = arith.constant dense<0.000000e+00> : vector<8x8x8xf32>
    %162 = tpu.matmul %161, %148, %cst_53 {dimension_numbers = #tpu.dot_dimension_numbers<[2], [1], [1], [2], [0, 0, 0, 1, 1, 2], [0], [0]>} : vector<8x8x8xf32>, vector<8x8x8xf32>, vector<8x8x8xf32> -> vector<8x8x8xf32>
    "tpu.trace_stop"() : () -> ()
    %163 = vector.extract_strided_slice %162 {offsets = [0, 0, 0], sizes = [2, 8, 8], strides = [1, 1, 1]} : vector<8x8x8xf32> to vector<2x8x8xf32>
    %164 = vector.extract_strided_slice %162 {offsets = [2, 0, 0], sizes = [2, 8, 8], strides = [1, 1, 1]} : vector<8x8x8xf32> to vector<2x8x8xf32>
    %165 = vector.extract_strided_slice %162 {offsets = [4, 0, 0], sizes = [2, 8, 8], strides = [1, 1, 1]} : vector<8x8x8xf32> to vector<2x8x8xf32>
    %166 = vector.extract_strided_slice %162 {offsets = [6, 0, 0], sizes = [2, 8, 8], strides = [1, 1, 1]} : vector<8x8x8xf32> to vector<2x8x8xf32>
    %167 = tpu.concatenate %163, %164, %165, %166 in 2 : vector<2x8x8xf32>, vector<2x8x8xf32>, vector<2x8x8xf32>, vector<2x8x8xf32> -> vector<2x8x32xf32>
    %168 = vector.shape_cast %167 : vector<2x8x32xf32> to vector<16x32xf32>
    %c544 = arith.constant 544 : index
    %c0_54 = arith.constant 0 : index
    %169 = vector.load %arg3[%c544, %c0_54] : memref<840x128xf32, #tpu.memory_space<vmem>>, vector<32x32xf32>
    %cst_55 = arith.constant dense<0.000000e+00> : vector<16x32xf32>
    %170 = tpu.matmul %168, %169, %cst_55 {dimension_numbers = #tpu.dot_dimension_numbers<[1], [0], [0], [1], [0, 0, 1, 1], [], []>} : vector<16x32xf32>, vector<32x32xf32>, vector<16x32xf32> -> vector<16x32xf32>
    %c576 = arith.constant 576 : index
    %c0_56 = arith.constant 0 : index
    %171 = vector.load %arg3[%c576, %c0_56] : memref<840x128xf32, #tpu.memory_space<vmem>>, vector<1x32xf32>
    %172 = vector.broadcast %171 : vector<1x32xf32> to vector<16x32xf32>
    %173 = arith.addf %170, %172 : vector<16x32xf32>
    %174 = arith.addf %127, %173 : vector<16x32xf32>
    %c584 = arith.constant 584 : index
    %c0_57 = arith.constant 0 : index
    %175 = vector.load %arg3[%c584, %c0_57] : memref<840x128xf32, #tpu.memory_space<vmem>>, vector<1x32xf32>
    %c592 = arith.constant 592 : index
    %c0_58 = arith.constant 0 : index
    %176 = vector.load %arg3[%c592, %c0_58] : memref<840x128xf32, #tpu.memory_space<vmem>>, vector<1x32xf32>
    %cst_59 = arith.constant dense<0.000000e+00> : vector<16xf32>
    %177 = vector.multi_reduction <add>, %174, %cst_59 [1] : vector<16x32xf32> to vector<16xf32>
    %178 = vector.shape_cast %177 : vector<16xf32> to vector<16x1xf32>
    %cst_60 = arith.constant 3.200000e+01 : f32
    %179 = vector.broadcast %cst_60 : f32 to vector<16x1xf32>
    %180 = arith.divf %178, %179 : vector<16x1xf32>
    %181 = vector.broadcast %180 : vector<16x1xf32> to vector<16x32xf32>
    %182 = arith.subf %174, %181 : vector<16x32xf32>
    %183 = arith.mulf %182, %182 : vector<16x32xf32>
    %cst_61 = arith.constant dense<0.000000e+00> : vector<16xf32>
    %184 = vector.multi_reduction <add>, %183, %cst_61 [1] : vector<16x32xf32> to vector<16xf32>
    %185 = vector.shape_cast %184 : vector<16xf32> to vector<16x1xf32>
    %cst_62 = arith.constant 3.200000e+01 : f32
    %186 = vector.broadcast %cst_62 : f32 to vector<16x1xf32>
    %187 = arith.divf %185, %186 : vector<16x1xf32>
    %cst_63 = arith.constant 9.99999974E-6 : f32
    %188 = vector.broadcast %cst_63 : f32 to vector<16x1xf32>
    %189 = arith.addf %187, %188 : vector<16x1xf32>
    %190 = math.rsqrt %189 : vector<16x1xf32>
    %191 = vector.broadcast %190 : vector<16x1xf32> to vector<16x32xf32>
    %192 = arith.mulf %182, %191 : vector<16x32xf32>
    %193 = vector.broadcast %175 : vector<1x32xf32> to vector<16x32xf32>
    %194 = arith.mulf %192, %193 : vector<16x32xf32>
    %195 = vector.broadcast %176 : vector<1x32xf32> to vector<16x32xf32>
    %196 = arith.addf %194, %195 : vector<16x32xf32>
    %c600 = arith.constant 600 : index
    %c0_64 = arith.constant 0 : index
    %197 = vector.load %arg3[%c600, %c0_64] : memref<840x128xf32, #tpu.memory_space<vmem>>, vector<32x64xf32>
    %cst_65 = arith.constant dense<0.000000e+00> : vector<16x64xf32>
    %198 = tpu.matmul %196, %197, %cst_65 {dimension_numbers = #tpu.dot_dimension_numbers<[1], [0], [0], [1], [0, 0, 1, 1], [], []>} : vector<16x32xf32>, vector<32x64xf32>, vector<16x64xf32> -> vector<16x64xf32>
    %c632 = arith.constant 632 : index
    %c0_66 = arith.constant 0 : index
    %199 = vector.load %arg3[%c632, %c0_66] : memref<840x128xf32, #tpu.memory_space<vmem>>, vector<1x64xf32>
    %200 = vector.broadcast %199 : vector<1x64xf32> to vector<16x64xf32>
    %201 = arith.addf %198, %200 : vector<16x64xf32>
    %cst_67 = arith.constant 0.000000e+00 : f32
    %202 = vector.broadcast %cst_67 : f32 to vector<16x64xf32>
    %203 = arith.maximumf %201, %202 : vector<16x64xf32>
    %c640 = arith.constant 640 : index
    %c0_68 = arith.constant 0 : index
    %204 = vector.load %arg3[%c640, %c0_68] : memref<840x128xf32, #tpu.memory_space<vmem>>, vector<64x32xf32>
    %cst_69 = arith.constant dense<0.000000e+00> : vector<16x32xf32>
    %205 = tpu.matmul %203, %204, %cst_69 {dimension_numbers = #tpu.dot_dimension_numbers<[1], [0], [0], [1], [0, 0, 1, 1], [], []>} : vector<16x64xf32>, vector<64x32xf32>, vector<16x32xf32> -> vector<16x32xf32>
    %c704 = arith.constant 704 : index
    %c0_70 = arith.constant 0 : index
    %206 = vector.load %arg3[%c704, %c0_70] : memref<840x128xf32, #tpu.memory_space<vmem>>, vector<1x32xf32>
    %207 = vector.broadcast %206 : vector<1x32xf32> to vector<16x32xf32>
    %208 = arith.addf %205, %207 : vector<16x32xf32>
    %209 = arith.addf %196, %208 : vector<16x32xf32>
    %c712 = arith.constant 712 : index
    %c0_71 = arith.constant 0 : index
    %210 = vector.load %arg3[%c712, %c0_71] : memref<840x128xf32, #tpu.memory_space<vmem>>, vector<1x32xf32>
    %c720 = arith.constant 720 : index
    %c0_72 = arith.constant 0 : index
    %211 = vector.load %arg3[%c720, %c0_72] : memref<840x128xf32, #tpu.memory_space<vmem>>, vector<1x32xf32>
    %cst_73 = arith.constant dense<0.000000e+00> : vector<16xf32>
    %212 = vector.multi_reduction <add>, %209, %cst_73 [1] : vector<16x32xf32> to vector<16xf32>
    %213 = vector.shape_cast %212 : vector<16xf32> to vector<16x1xf32>
    %cst_74 = arith.constant 3.200000e+01 : f32
    %214 = vector.broadcast %cst_74 : f32 to vector<16x1xf32>
    %215 = arith.divf %213, %214 : vector<16x1xf32>
    %216 = vector.broadcast %215 : vector<16x1xf32> to vector<16x32xf32>
    %217 = arith.subf %209, %216 : vector<16x32xf32>
    %218 = arith.mulf %217, %217 : vector<16x32xf32>
    %cst_75 = arith.constant dense<0.000000e+00> : vector<16xf32>
    %219 = vector.multi_reduction <add>, %218, %cst_75 [1] : vector<16x32xf32> to vector<16xf32>
    %220 = vector.shape_cast %219 : vector<16xf32> to vector<16x1xf32>
    %cst_76 = arith.constant 3.200000e+01 : f32
    %221 = vector.broadcast %cst_76 : f32 to vector<16x1xf32>
    %222 = arith.divf %220, %221 : vector<16x1xf32>
    %cst_77 = arith.constant 9.99999974E-6 : f32
    %223 = vector.broadcast %cst_77 : f32 to vector<16x1xf32>
    %224 = arith.addf %222, %223 : vector<16x1xf32>
    %225 = math.rsqrt %224 : vector<16x1xf32>
    %226 = vector.broadcast %225 : vector<16x1xf32> to vector<16x32xf32>
    %227 = arith.mulf %217, %226 : vector<16x32xf32>
    %228 = vector.broadcast %210 : vector<1x32xf32> to vector<16x32xf32>
    %229 = arith.mulf %227, %228 : vector<16x32xf32>
    %230 = vector.broadcast %211 : vector<1x32xf32> to vector<16x32xf32>
    %231 = arith.addf %229, %230 : vector<16x32xf32>
    %c728 = arith.constant 728 : index
    %c0_78 = arith.constant 0 : index
    %232 = vector.load %arg3[%c728, %c0_78] : memref<840x128xf32, #tpu.memory_space<vmem>>, vector<32x64xf32>
    %cst_79 = arith.constant dense<0.000000e+00> : vector<16x64xf32>
    %233 = tpu.matmul %231, %232, %cst_79 {dimension_numbers = #tpu.dot_dimension_numbers<[1], [0], [0], [1], [0, 0, 1, 1], [], []>} : vector<16x32xf32>, vector<32x64xf32>, vector<16x64xf32> -> vector<16x64xf32>
    %c760 = arith.constant 760 : index
    %c0_80 = arith.constant 0 : index
    %234 = vector.load %arg3[%c760, %c0_80] : memref<840x128xf32, #tpu.memory_space<vmem>>, vector<1x64xf32>
    %235 = vector.broadcast %234 : vector<1x64xf32> to vector<16x64xf32>
    %236 = arith.addf %233, %235 : vector<16x64xf32>
    %cst_81 = arith.constant 0.000000e+00 : f32
    %237 = vector.broadcast %cst_81 : f32 to vector<16x64xf32>
    %238 = arith.maximumf %236, %237 : vector<16x64xf32>
    %c768 = arith.constant 768 : index
    %c0_82 = arith.constant 0 : index
    %239 = vector.load %arg3[%c768, %c0_82] : memref<840x128xf32, #tpu.memory_space<vmem>>, vector<64x128xf32>
    %cst_83 = arith.constant dense<0.000000e+00> : vector<16x128xf32>
    %240 = tpu.matmul %238, %239, %cst_83 {dimension_numbers = #tpu.dot_dimension_numbers<[1], [0], [0], [1], [0, 0, 1, 1], [], []>} : vector<16x64xf32>, vector<64x128xf32>, vector<16x128xf32> -> vector<16x128xf32>
    %c832 = arith.constant 832 : index
    %c0_84 = arith.constant 0 : index
    %241 = vector.load %arg3[%c832, %c0_84] : memref<840x128xf32, #tpu.memory_space<vmem>>, vector<1x128xf32>
    %242 = vector.broadcast %241 : vector<1x128xf32> to vector<16x128xf32>
    %243 = arith.addf %240, %242 : vector<16x128xf32>
    %c0_85 = arith.constant 0 : index
    %c0_86 = arith.constant 0 : index
    %244 = vector.load %arg4[%c0_85, %c0_86] : memref<16x128xf32, #tpu.memory_space<vmem>>, vector<16x128xf32>
    tpu.vector_store %arg4[%c0_85, %c0_86], %243 {strides = array<i32>} : memref<16x128xf32, #tpu.memory_space<vmem>>, vector<16x128xf32>,
    return
  }
}

</mosaic_0001>

<bundles_post_ra>
// kernel: context_encoder_forward.1
= control target key start
LH: loop header
LB: loop body
LE: loop exit
PB: predicated region body
PF: predicated region fallthrough
CT: control target
= control target key end

     0   :  { %9 = vsyncpa [#allocation3], 0  ;;  %s2113_s18 = smov [#allocation2]   ;;  %s2114_s20 = smov 128   ;;  %s2524_s0 = inlined_call_operand.vmem [shape: f32[16,69], index: 0, kind: input, shape index: {}]   ;;  %s2525_s1 = inlined_call_operand.vmem [shape: f32[16,32], index: 1, kind: input, shape index: {}]   ;;  %s2526_s2 = inlined_call_operand.vmem [shape: f32[2,8], index: 2, kind: input, shape index: {}]   ;;  %s2527_s3 = inlined_call_operand.hbm [shape: f32[840,128], index: 3, kind: input, shape index: {}]   ;;  %s2528_s4 = inlined_call_operand.vmem [shape: f32[16,128], index: 4, kind: output, shape index: {}]  }
   0x1   :  { %s20_s17 = sshll.u32 %s2527_s3, 4  ;;  %s22_s19 = sshll.u32 %s2113_s18, 4  ;;  %s21_s17 = int_to_ptr.hbm [resolvable:$true] %s20_s17  ;;  %s23_s19 = int_to_ptr.vmem [resolvable:$true] %s22_s19 }
   0x2   :  { %s2115_s21 = smov 8  }
   0x3   :  { %28 = dma.hbm_to_vmem [thread:$0]  %s21_s17, 13440, %s23_s19, [#allocation3], %s2114_s20, %s2114_s20, %s2115_s21  }
   0x4   :  { %2111 = dma.done.wait [#allocation3], 13440  }
   0x5   :  { %2112 = vsyncadd [#allocation3], 4294953856  ;;  %vm53_vm0 = vcmask 1044480   ;;  %v43_v0 = vld [vmem:[#allocation2 + $0x40] sm:$0x1f]  ;;  %v42_v1 = vld [vmem:[#allocation2 + $0x38] sm:$0xff] }
   0x6   :  { %1871 = vmatpush.msk.msra.mxu0 %vm53_vm0, %v43_v0  ;;  %v41_v2 = vld [vmem:[#allocation2 + $0x30] sm:$0xff]  ;;  %v97_v3 = vld [vmem:[#allocation2 + $0xc8] sm:$0xff]  ;;  %v96_v5 = vld [vmem:[#allocation2 + $0xc0] sm:$0xff]  ;;  %vm46_vm1 = vcmask 564224   ;;  %vm135_vm2 = vcmask 523264   ;;  %vm175_vm3 = vcmask 261120  }
   0x7   :  { %v40_v4 = vld [vmem:[#allocation2 + $0x28] sm:$0xff]  ;;  %100 = vmatpush.msra.mxu1 %v97_v3  ;;  %v95_v6 = vld [vmem:[#allocation2 + $0xb8] sm:$0xff]  ;;  %v39_v7 = vld [vmem:[#allocation2 + $0x20] sm:$0xff]  ;;  %s2116_s28 = smov 104   ;;  %s2117_s29 = smov 120   ;;  %vm225_vm4 = vcmask 64512  }
   0x8   :  { %65 = vmatpush.msra.mxu0 %v42_v1  ;;  %v38_v8 = vld [vmem:[#allocation2 + $0x18] sm:$0xff]  ;;  %v94_v9 = vld [vmem:[#allocation2 + $0xb0] sm:$0xff]  ;;  %v93_v11 = vld [vmem:[#allocation2 + $0xa8] sm:$0xff]  ;;  %s2119_s30 = smov 96   ;;  %s2121_s7 = smov 24   ;;  %vm754_vm5 = vcmask 130048  }
   0x9   :  { %101 = vmatpush.msra.mxu1 %v96_v5  ;;  %v37_v10 = vld [vmem:[#allocation2 + $0x10] sm:$0xff]  ;;  %v92_v12 = vld [vmem:[#allocation2 + $0xa0] sm:$0xff]  ;;  %v36_v13 = vld [vmem:[#allocation2 + $0x8] sm:$0xff]  ;;  %s2122_s8 = smov 16   ;;  %vm757_vm6 = vcmask 195584  }
   0xa   :  { %66 = vmatpush.msra.mxu0 %v41_v2  ;;  %v91_v14 = vld [vmem:[#allocation2 + $0x98] sm:$0xff]  ;;  %v35_v15 = vld [vmem:[#allocation2] sm:$0xff]  ;;  %v90_v17 = vld [vmem:[#allocation2 + $0x90] sm:$0xff] }
   0xb   :  { %102 = vmatpush.msra.mxu1 %v95_v6  ;;  %v33_v16 = vld [vmem:[%s2524_s0] sm:$0xff]  ;;  %v89_v18 = vld [vmem:[#allocation2 + $0x88] sm:$0xff]  ;;  %v87_v20 = vld [vmem:[#allocation2 + $0x78] sm:$0xff] }
   0xc   :  { %67 = vmatpush.msra.mxu0 %v40_v4  ;;  %v88_v19 = vld [vmem:[#allocation2 + $0x80] sm:$0xff]  ;;  %v34_v21 = vld [vmem:[%s2524_s0 + $0x8] sm:$0xff]  ;;  %v86_v22 = vld [vmem:[#allocation2 + $0x70] sm:$0xff] }
   0xd   :  { %103 = vmatpush.msra.mxu1 %v94_v9  ;;  %v85_v23 = vld [vmem:[#allocation2 + $0x68] sm:$0xff]  ;;  %v84_v24 = vld [vmem:[#allocation2 + $0x60] sm:$0xff]  ;;  %v83_v25 = vld [vmem:[#allocation2 + $0x58] sm:$0xff] }
   0xe   :  { %68 = vmatpush.msra.mxu0 %v39_v7  ;;  %v82_v26 = vld [vmem:[#allocation2 + $0x50] sm:$0xff]  ;;  %v131_v28 = vld [vmem:[#allocation2 + $0x108] sm:$0xff]  ;;  %v130_v29 = vld [vmem:[#allocation2 + $0x100] sm:$0xff] }
   0xf   :  { %104 = vmatpush.msra.mxu1 %v93_v11  ;;  %v132_v27 = vld [vmem:[#allocation2 + $0x110] sm:$0xff]  ;;  %v129_v30 = vld [vmem:[#allocation2 + $0xf8] sm:$0xff]  ;;  %v1985_v32 = vld [vmem:[#allocation2 + $0x48] ss:$0 sm:$0xff] }
  0x10   :  { %69 = vmatpush.msra.mxu0 %v38_v8  ;;  %150 = vmatpush.msra.mxu2 %v132_v27  ;;  %v128_v31 = vld [vmem:[#allocation2 + $0xf0] sm:$0xff]  ;;  %v127_v39 = vld [vmem:[#allocation2 + $0xe8] sm:$0xff]  ;;  %v126_v40 = vld [vmem:[#allocation2 + $0xe0] sm:$0xff] }
  0x11   :  { %105 = vmatpush.msra.mxu1 %v92_v12  ;;  %v125_v41 = vld [vmem:[#allocation2 + $0xd8] sm:$0xff]  ;;  %v172_v42 = vld [vmem:[#allocation2 + $0x130] sm:$0xff]  ;;  %v171_v43 = vld [vmem:[#allocation2 + $0x128] sm:$0xff] }
  0x12   :  { %70 = vmatpush.msra.mxu0 %v37_v10  ;;  %151 = vmatpush.msra.mxu2 %v131_v28  ;;  %v1986_v44 = vld [vmem:[#allocation2 + $0xd0] ss:$0 sm:$0xff]  ;;  %v170_v51 = vld [vmem:[#allocation2 + $0x120] sm:$0xff]  ;;  %v169_v52 = vld [vmem:[#allocation2 + $0x118] sm:$0xff] }
  0x13   :  { %106 = vmatpush.msra.mxu1 %v91_v14  ;;  %194 = vmatpush.msra.mxu3 %v172_v42  ;;  %v133_v53 = vld [vmem:[%s2525_s1] sm:$0xff]  ;;  %v134_v56 = vld [vmem:[%s2525_s1 + $0x8] sm:$0xff]  ;;  %v1987_v59 = vld [vmem:[#allocation2 + $0x138] ss:$0 sm:$0xff]  ;;  %s2118_s1 = smov 112  }
  0x14   :  { %71 = vmatpush.msra.mxu0 %v36_v13  ;;  %152 = vmatpush.msra.mxu2 %v130_v29  ;;  %v165_v14 = vld [vmem:[%s2526_s2] sm:$0x3]  ;;  %s2120_s2 = smov 64  }
  0x15   :  { %107 = vmatpush.msra.mxu1 %v90_v17  ;;  %195 = vmatpush.msra.mxu3 %v171_v43 }
  0x16   :  { %72 = vmatpush.msra.mxu0 %v35_v15  ;;  %153 = vmatpush.msra.mxu2 %v129_v30  ;;  %v166_v15 = vmul.f32 -1e+09, %v165_v14 }
  0x17   :  { %1872 = vmatmul.msk.f32.vlgmr.msra.gmra.mxu0 %vm46_vm1, %v33_v16  ;;  %108 = vmatpush.msra.mxu1 %v89_v18 }
  0x18   :  { %154 = vmatpush.msra.mxu2 %v128_v31  ;;  %196 = vmatpush.msra.mxu3 %v170_v51  ;;  %v2246_v16 = vperm.slane %v166_v15, 0  ;;  %v168_v18 = vrot.slane %v166_v15, 1 }
  0x19   :  { %109 = vmatpush.msra.mxu1 %v88_v19 }
  0x1a   :  { %155 = vmatpush.msra.mxu2 %v127_v39  ;;  %197 = vmatpush.msra.mxu3 %v169_v52 }
  0x1b   :  { %110 = vmatpush.msra.mxu1 %v87_v20 }
  0x1c   :  { %156 = vmatpush.msra.mxu2 %v126_v40 }
  0x1d   :  { %111 = vmatpush.msra.mxu1 %v86_v22 }
  0x1e   :  { %157 = vmatpush.msra.mxu2 %v125_v41 }
  0x1f   :  { %1873 = vmatmul.msk.f32.gmra.mxu0 %vm46_vm1, %v34_v21  ;;  %112 = vmatpush.msra.mxu1 %v85_v23  ;;  %v2250_v21 = vperm.slane %v168_v18, 0 }
  0x21   :  { %113 = vmatpush.msra.mxu1 %v84_v24 }
  0x23   :  { %114 = vmatpush.msra.mxu1 %v83_v25 }
  0x25   :  { %115 = vmatpush.msra.mxu1 %v82_v26 }
  0x94   :  { %v74_v33 = vpop.f32.mrf.mxu0 }
  0x95   :  { %v75_v34 = vadd.f32 %v1985_v32, %v74_v33 }
  0x97   :  { %v80_v35 = vmax.f32 %v75_v34, 0.0 }
  0x99   :  { %116 = vmatmul.f32.vlgmr.msra.gmra.mxu1 %v80_v35 }
  0x9c   :  { %v77_v36 = vpop.f32.mrf.mxu0 }
  0x9d   :  { %v78_v37 = vadd.f32 %v1985_v32, %v77_v36 }
  0x9f   :  { %v81_v38 = vmax.f32 %v78_v37, 0.0 }
  0xa1   :  { %119 = vmatmul.f32.gmra.mxu1 %v81_v38 }
 0x116   :  { %v117_v45 = vpop.f32.mrf.mxu1 }
 0x117   :  { %v118_v46 = vadd.f32 %v1986_v44, %v117_v45 }
 0x119   :  { %v123_v47 = vmax.f32 %v118_v46, 0.0 }
 0x11b   :  { %1874 = vmatmul.msk.f32.vlgmr.msra.gmra.mxu2 %vm135_vm2, %v123_v47 }
 0x11e   :  { %v120_v48 = vpop.f32.mrf.mxu1 }
 0x11f   :  { %v121_v49 = vadd.f32 %v1986_v44, %v120_v48 }
 0x121   :  { %v124_v50 = vmax.f32 %v121_v49, 0.0 }
 0x123   :  { %1875 = vmatmul.msk.f32.gmra.mxu2 %vm135_vm2, %v124_v50 }
 0x19e   :  { %v159_v54 = vpop.f32.mrf.mxu2 }
 0x19f   :  { %v2164_v55 = vadd.f32 %v159_v54, %v133_v53 }
 0x1a1   :  { %1876 = vmatmul.msk.f32.vlgmr.msra.gmra.mxu3 %vm175_vm3, %v2164_v55 }
 0x1a6   :  { %v162_v57 = vpop.f32.mrf.mxu2 }
 0x1a7   :  { %v2171_v58 = vadd.f32 %v162_v57, %v134_v56 }
 0x1a9   :  { %1877 = vmatmul.msk.f32.gmra.mxu3 %vm175_vm3, %v2171_v58 }
 0x224   :  { %v199_v60 = vpop.f32.mrf.mxu3 }
 0x225   :  { %v2175_v61 = vadd.f32 %v1987_v59, %v199_v60 }
 0x227   :  { %215 = vrot.lane.b32.xlu2 %v2175_v61, %s2116_s28  ;;  %207 = vrot.lane.b32.xlu0 %v2175_v61, %s2117_s29 }
 0x22c   :  { %v202_v62 = vpop.f32.mrf.mxu3 }
 0x22d   :  { %v2181_v63 = vadd.f32 %v1987_v59, %v202_v62 }
 0x22f   :  { %209 = vrot.lane.b32.xlu1 %v2181_v63, %s2117_s29  ;;  %211 = vrot.lane.b32.xlu0 %v2175_v61, %s2118_s1 }
 0x230   :  { %217 = vrot.lane.b32.xlu2 %v2181_v63, %s2116_s28 }
 0x237   :  { %213 = vrot.lane.b32.xlu1 %v2181_v63, %s2118_s1  ;;  %223 = vrot.lane.b32.xlu0 %v2175_v61, %s2119_s30 }
 0x23f   :  { %250 = vrot.lane.b32.xlu1 %v2181_v63, %s2119_s30 }
 0x281   :  { %v2199_v1 = vpop.permute.xlu2 %215 }
 0x28a   :  { %v2209_v4 = vpop.permute.xlu2 %217 }
 0x299   :  { %v2195_v0 = vpop.permute.xlu0 %207 }
 0x29a   :  { %276 = vrot.lane.b32.xlu2 %v2195_v0, %s2119_s30  ;;  %v1955_v39 = vpack.i.bf16 %v2195_v0, %v2175_v61 }
 0x2a1   :  { %v2201_v2 = vpop.permute.xlu1 %209  ;;  %v2203_v3 = vpop.permute.xlu0 %211 }
 0x2a2   :  { %302 = vrot.lane.b32.xlu1 %v2201_v2, %s2119_s30  ;;  %328 = vrot.lane.b32.xlu0 %v2203_v3, %s2119_s30 }
 0x2a9   :  { %v2211_v5 = vpop.permute.xlu1 %213  ;;  %v224_v6 = vpop.permute.xlu0 %223 }
 0x2aa   :  { %406 = vrot.lane.b32.xlu1 %v2209_v4, %s2119_s30  ;;  %354 = vrot.lane.b32.xlu2 %v2211_v5, %s2119_s30 }
 0x2ab   :  { %380 = vrot.lane.b32.xlu0 %v2199_v1, %s2119_s30  ;;  %1878 = vmatpush.xpose.msk.msrb.mxu3 %vm225_vm4, %v224_v6 }
 0x2ae   :  { %1879 = vmatmul.msk.f32.vlgmr.msrb.gmra.mxu3 %vm225_vm4, %v2175_v61 }
 0x2b1   :  { %v251_v7 = vpop.permute.xlu1 %250 }
 0x2b2   :  { %1880 = vmatpush.xpose.msk.msrb.mxu2 %vm225_vm4, %v251_v7 }
 0x2b5   :  { %1881 = vmatmul.msk.f32.vlgmr.msrb.gmra.mxu2 %vm225_vm4, %v2181_v63 }
 0x2f4   :  { %v277_v8 = vpop.permute.xlu2 %276 }
 0x2f5   :  { %1882 = vmatpush.xpose.msk.msra.mxu3 %vm225_vm4, %v277_v8  ;;  %v1965_v8 = vpack.i.bf16 %v2199_v1, %v2201_v2 }
 0x2f8   :  { %1883 = vmatmul.msk.f32.vlgmr.msra.gmra.mxu3 %vm225_vm4, %v2195_v0 }
 0x304   :  { %v355_v9 = vpop.permute.xlu2 %354 }
 0x305   :  { %1888 = vmatpush.xpose.msk.msrb.mxu3 %vm225_vm4, %v355_v9 }
 0x308   :  { %1889 = vmatmul.msk.f32.vlgmr.msrb.gmra.mxu3 %vm225_vm4, %v2211_v5 }
 0x314   :  { %v303_v10 = vpop.permute.xlu1 %302  ;;  %v329_v11 = vpop.permute.xlu0 %328 }
 0x315   :  { %1884 = vmatpush.xpose.msk.msrb.mxu0 %vm225_vm4, %v303_v10  ;;  %1886 = vmatpush.xpose.msk.msra.mxu2 %vm225_vm4, %v329_v11 }
 0x318   :  { %1885 = vmatmul.msk.f32.vlgmr.msrb.gmra.mxu0 %vm225_vm4, %v2201_v2  ;;  %1887 = vmatmul.msk.f32.vlgmr.msra.gmra.mxu2 %vm225_vm4, %v2203_v3 }
 0x31c   :  { %v407_v12 = vpop.permute.xlu1 %406 }
 0x31d   :  { %v381_v13 = vpop.permute.xlu0 %380 }
 0x31e   :  { %1890 = vmatpush.xpose.msk.msra.mxu0 %vm225_vm4, %v381_v13 }
 0x321   :  { %1891 = vmatmul.msk.f32.vlgmr.msra.gmra.mxu0 %vm225_vm4, %v2199_v1 }
 0x322   :  { %1892 = vmatpush.xpose.msk.msrb.mxu0 %vm225_vm4, %v407_v12 }
 0x329   :  { %1893 = vmatmul.msk.f32.vlgmr.msrb.gmra.mxu0 %vm225_vm4, %v2209_v4 }
 0x331   :  { %v247_v17 = vpop.f32.mrf.mxu3 }
 0x332   :  { %v248_v19 = vadd.f32 %v247_v17, %v2246_v16 }
 0x334   :  { %v432_v20 = vsel %vm225_vm4, %v248_v19, -inf }
 0x335   :  { %433 = vmax.xlane.f32.xlu2 %v432_v20 }
 0x338   :  { %v273_v22 = vpop.f32.mrf.mxu2 }
 0x339   :  { %v274_v23 = vadd.f32 %v273_v22, %v2250_v21 }
 0x33b   :  { %v435_v24 = vsel %vm225_vm4, %v274_v23, -inf }
 0x33c   :  { %436 = vmax.xlane.f32.xlu1 %v435_v24 }
 0x37b   :  { %v299_v25 = vpop.f32.mrf.mxu3 }
 0x37c   :  { %v300_v26 = vadd.f32 %v299_v25, %v2246_v16 }
 0x37e   :  { %v438_v27 = vsel %vm225_vm4, %v300_v26, -inf }
 0x37f   :  { %439 = vmax.xlane.f32.xlu0 %v438_v27 }
 0x38b   :  { %v377_v28 = vpop.f32.mrf.mxu3 }
 0x38c   :  { %v2257_v29 = vadd.f32 %v377_v28, %v2250_v21 }
 0x38e   :  { %v447_v30 = vsel %vm225_vm4, %v2257_v29, -inf }
 0x38f   :  { %448 = vmax.xlane.f32.xlu1 %v447_v30 }
 0x395   :  { %v325_v31 = vpop.f32.mrf.mxu0 }
 0x396   :  { %v326_v38 = vadd.f32 %v325_v31, %v2250_v21 }
 0x398   :  { %v441_v40 = vsel %vm225_vm4, %v326_v38, -inf }
 0x39b   :  { %v351_v32 = vpop.f32.mrf.mxu2 }
 0x39c   :  { %v352_v33 = vadd.f32 %v351_v32, %v2246_v16 }
 0x39e   :  { %v403_v34 = vpop.f32.mrf.mxu0  ;;  %v444_v35 = vsel %vm225_vm4, %v352_v33, -inf }
 0x39f   :  { %v404_v36 = vadd.f32 %v403_v34, %v2246_v16  ;;  %445 = vmax.xlane.f32.xlu2 %v444_v35  ;;  %v1960_v34 = vpack.i.bf16 %v2203_v3, %v2181_v63 }
 0x3a1   :  { %v450_v37 = vsel %vm225_vm4, %v404_v36, -inf }
 0x3a2   :  { %451 = vmax.xlane.f32.xlu0 %v450_v37 }
 0x3a6   :  { %v429_v41 = vpop.f32.mrf.mxu0 }
 0x3a7   :  { %442 = vmax.xlane.f32.xlu2 %v441_v40  ;;  %v430_v44 = vadd.f32 %v429_v41, %v2250_v21 }
 0x3a8   :  { %v434_v42 = vpop.xlane.xlu2 %433  ;;  %1956 = vrot.lane.b32.xlu1 %v1955_v39, %s2120_s2 }
 0x3a9   :  { %v456_v43 = vsub.f32 %v248_v19, %v434_v42  ;;  %v453_v46 = vsel %vm225_vm4, %v430_v44, -inf }
 0x3ab   :  { %v464_v45 = vmul.f32 1.442695, %v456_v43 }
 0x3ad   :  { %2005 = vpow2.f32 %v464_v45 }
 0x3af   :  { %v437_v47 = vpop.xlane.xlu1 %436  ;;  %454 = vmax.xlane.f32.xlu2 %v453_v46 }
 0x3b0   :  { %v457_v48 = vsub.f32 %v274_v23, %v437_v47 }
 0x3b2   :  { %v466_v49 = vmul.f32 1.442695, %v457_v48 }
 0x3b3   :  { %v2006_v50 = vpop.eup %2005 }
 0x3b4   :  { %2007 = vpow2.f32 %v466_v49  ;;  %v480_v51 = vsel %vm225_vm4, %v2006_v50, 0.0 }
 0x3b5   :  { %481 = vadd.xlane.f32.xlu0 %v480_v51 }
 0x3ba   :  { %v2273_v52 = vpop.eup %2007 }
 0x3bb   :  { %v483_v53 = vsel %vm225_vm4, %v2273_v52, 0.0 }
 0x3bc   :  { %484 = vadd.xlane.f32.xlu2 %v483_v53 }
 0x3f2   :  { %v440_v54 = vpop.xlane.xlu0 %439 }
 0x3f3   :  { %v458_v56 = vsub.f32 %v300_v26, %v440_v54 }
 0x3f5   :  { %v468_v57 = vmul.f32 1.442695, %v458_v56 }
 0x3f7   :  { %2009 = vpow2.f32 %v468_v57 }
 0x3fd   :  { %v2010_v59 = vpop.eup %2009 }
 0x3fe   :  { %v486_v60 = vsel %vm225_vm4, %v2010_v59, 0.0 }
 0x3ff   :  { %487 = vadd.xlane.f32.xlu1 %v486_v60 }
 0x402   :  { %v449_v61 = vpop.xlane.xlu1 %448 }
 0x403   :  { %v461_v18 = vsub.f32 %v2257_v29, %v449_v61 }
 0x405   :  { %v474_v2 = vmul.f32 1.442695, %v461_v18 }
 0x412   :  { %v446_v62 = vpop.xlane.xlu2 %445 }
 0x413   :  { %v460_v0 = vsub.f32 %v352_v33, %v446_v62 }
 0x415   :  { %v472_v6 = vmul.f32 1.442695, %v460_v0  ;;  %v452_v7 = vpop.xlane.xlu0 %451 }
 0x416   :  { %v462_v9 = vsub.f32 %v404_v36, %v452_v7 }
 0x417   :  { %2011 = vpow2.f32 %v472_v6 }
 0x418   :  { %1966 = vrot.lane.b32.xlu1 %v1965_v8, %s2120_s2  ;;  %v476_v10 = vmul.f32 1.442695, %v462_v9 }
 0x41a   :  { %v1957_v11 = vpop.permute.xlu1 %1956  ;;  %v443_v12 = vpop.xlane.xlu2 %442  ;;  %2013 = vpow2.f32 %v476_v10 }
 0x41b   :  { %v1959_v13 = vunpack.i.h.bf16 %v1957_v11  ;;  %v1958_v14 = vunpack.i.l.bf16 %v1957_v11  ;;  %v459_v15 = vsub.f32 %v326_v38, %v443_v12 }
 0x41d   :  { %v2281_v17 = vpop.eup %2011  ;;  %v470_v19 = vmul.f32 1.442695, %v459_v15  ;;  %541 = vmatpush.msrb.mxu2 %v1958_v14  ;;  %593 = vmatpush.msra.mxu0 %v1959_v13  ;;  %v763_v13 = vld [vmem:[#allocation2 + $0x158] sm:$0xff]  ;;  %v762_v14 = vld [vmem:[#allocation2 + $0x150] sm:$0xff]  ;;  %v761_v15 = vld [vmem:[#allocation2 + $0x148] sm:$0xff] }
 0x41e   :  { %v492_v1 = vsel %vm225_vm4, %v2281_v17, 0.0 }
 0x41f   :  { %2015 = vpow2.f32 %v470_v19  ;;  %493 = vadd.xlane.f32.xlu0 %v492_v1 }
 0x420   :  { %702 = vrot.lane.b32.xlu1 %v2209_v4, %s2120_s2  ;;  %v2014_v22 = vpop.eup %2013  ;;  %2017 = vpow2.f32 %v474_v2 }
 0x421   :  { %v498_v26 = vsel %vm225_vm4, %v2014_v22, 0.0 }
 0x422   :  { %v455_v20 = vpop.xlane.xlu2 %454 }
 0x423   :  { %v463_v24 = vsub.f32 %v430_v44, %v455_v20 }
 0x425   :  { %v2016_v23 = vpop.eup %2015  ;;  %v478_v28 = vmul.f32 1.442695, %v463_v24 }
 0x426   :  { %v489_v25 = vsel %vm225_vm4, %v2016_v23, 0.0  ;;  %v2018_v29 = vpop.eup %2017 }
 0x427   :  { %490 = vadd.xlane.f32.xlu2 %v489_v25  ;;  %499 = vadd.xlane.f32.xlu0 %v498_v26  ;;  %v495_v30 = vsel %vm225_vm4, %v2018_v29, 0.0 }
 0x428   :  { %v482_v27 = vpop.xlane.xlu0 %481 }
 0x429   :  { %2019 = vrcp.f32 %v482_v27 }
 0x42a   :  { %2021 = vpow2.f32 %v478_v28 }
 0x42f   :  { %v2020_v4 = vpop.eup %2019  ;;  %496 = vadd.xlane.f32.xlu2 %v495_v30  ;;  %v485_v41 = vpop.xlane.xlu2 %484 }
 0x430   :  { %v512_v31 = vmul.f32 %v2020_v4, %v2006_v50  ;;  %v2022_v32 = vpop.eup %2021 }
 0x431   :  { %v501_v33 = vsel %vm225_vm4, %v2022_v32, 0.0 }
 0x432   :  { %1894 = vmatmul.msk.f32.vlgmr.msrb.gmra.mxu2 %vm225_vm4, %v512_v31 }
 0x437   :  { %502 = vadd.xlane.f32.xlu2 %v501_v33 }
 0x43b   :  { %1961 = vrot.lane.b32.xlu0 %v1960_v34, %s2120_s2 }
 0x44f   :  { %650 = vrot.lane.b32.xlu2 %v2211_v5, %s2120_s2 }
 0x472   :  { %v488_v35 = vpop.xlane.xlu1 %487 }
 0x473   :  { %2023 = vrcp.f32 %v488_v35 }
 0x479   :  { %v2024_v36 = vpop.eup %2023 }
 0x47a   :  { %v514_v37 = vmul.f32 %v2024_v36, %v2010_v59 }
 0x47c   :  { %1896 = vmatmul.msk.f32.vlgmr.msra.gmra.mxu0 %vm225_vm4, %v514_v37  ;;  %v2123_v37 = vmov 32.0  }
 0x48a   :  { %v1967_v38 = vpop.permute.xlu1 %1966 }
 0x48b   :  { %v1969_v39 = vunpack.i.h.bf16 %v1967_v38  ;;  %v1968_v40 = vunpack.i.l.bf16 %v1967_v38 }
 0x48d   :  { %619 = vmatpush.msrb.mxu1 %v1968_v40  ;;  %697 = vmatpush.msrb.mxu0 %v1969_v39 }
 0x492   :  { %v703_v42 = vpop.permute.xlu1 %702  ;;  %v494_v43 = vpop.xlane.xlu0 %493 }
 0x493   :  { %723 = vmatpush.msra.mxu1 %v703_v42 }
 0x49a   :  { %v491_v63 = vpop.xlane.xlu2 %490  ;;  %v500_v3 = vpop.xlane.xlu0 %499 }
 0x49b   :  { %2025 = vrcp.f32 %v491_v63 }
 0x49c   :  { %2027 = vrcp.f32 %v500_v3 }
 0x49d   :  { %2029 = vrcp.f32 %v485_v41 }
 0x49e   :  { %2031 = vrcp.f32 %v494_v43 }
 0x4a1   :  { %v2026_v5 = vpop.eup %2025 }
 0x4a2   :  { %v2028_v44 = vpop.eup %2027  ;;  %v497_v45 = vpop.xlane.xlu2 %496  ;;  %v515_v46 = vmul.f32 %v2026_v5, %v2016_v23 }
 0x4a3   :  { %v518_v47 = vmul.f32 %v2028_v44, %v2014_v22  ;;  %v2030_v49 = vpop.eup %2029 }
 0x4a4   :  { %1897 = vmatmul.msk.f32.vlgmr.msrb.gmra.mxu1 %vm225_vm4, %v515_v46  ;;  %v2032_v50 = vpop.eup %2031  ;;  %v513_v56 = vmul.f32 %v2030_v49, %v2273_v52  ;;  %v859_v49 = vld [vmem:[#allocation2 + $0x190] sm:$0xff] }
 0x4a5   :  { %1900 = vmatmul.msk.f32.vlgmr.msrb.gmra.mxu0 %vm225_vm4, %v518_v47  ;;  %v516_v57 = vmul.f32 %v2032_v50, %v2281_v17  ;;  %v760_v17 = vld [vmem:[#allocation2 + $0x140] sm:$0xff]  ;;  %v858_v50 = vld [vmem:[#allocation2 + $0x188] sm:$0xff] }
 0x4aa   :  { %v503_v48 = vpop.xlane.xlu2 %502 }
 0x4ab   :  { %2033 = vrcp.f32 %v503_v48 }
 0x4ac   :  { %2035 = vrcp.f32 %v497_v45 }
 0x4ad   :  { %v1962_v51 = vpop.permute.xlu0 %1961  ;;  %2037 = vrcp.f32 %v2123_v37 }
 0x4ae   :  { %v1964_v53 = vunpack.i.h.bf16 %v1962_v51  ;;  %v1963_v54 = vunpack.i.l.bf16 %v1962_v51  ;;  %v857_v51 = vld [vmem:[#allocation2 + $0x180] sm:$0xff] }
 0x4b0   :  { %567 = vmatpush.msra.mxu3 %v1963_v54  ;;  %645 = vmatpush.msra.mxu2 %v1964_v53  ;;  %v856_v53 = vld [vmem:[#allocation2 + $0x178] sm:$0xff] }
 0x4b1   :  { %v2034_v59 = vpop.eup %2033  ;;  %1895 = vmatmul.msk.f32.vlgmr.msra.gmra.mxu3 %vm225_vm4, %v513_v56  ;;  %1898 = vmatmul.msk.f32.vlgmr.msra.gmra.mxu2 %vm225_vm4, %v516_v57 }
 0x4b2   :  { %v519_v60 = vmul.f32 %v2034_v59, %v2022_v32  ;;  %v651_v61 = vpop.permute.xlu2 %650  ;;  %v2036_v62 = vpop.eup %2035  ;;  %784 = vmatpush.msrb.mxu2 %v763_v13  ;;  %v900_v59 = vld [vmem:[#allocation2 + $0x1d8] sm:$0xff] }
 0x4b3   :  { %671 = vmatpush.msrb.mxu3 %v651_v61  ;;  %v517_v0 = vmul.f32 %v2036_v62, %v2018_v29  ;;  %v1988_v29 = vld [vmem:[#allocation2 + $0x160] ss:$0 sm:$0xff]  ;;  %v2038_v38 = vpop.eup %2037  ;;  %917 = vmatpush.msra.mxu0 %v900_v59  ;;  %v898_v61 = vld [vmem:[#allocation2 + $0x1c8] sm:$0xff] }
 0x4b4   :  { %1901 = vmatmul.msk.f32.vlgmr.msra.gmra.mxu1 %vm225_vm4, %v519_v60  ;;  %785 = vmatpush.msrb.mxu2 %v762_v14  ;;  %v806_v39 = vmul.f32 32.0, %v2038_v38  ;;  %vm810_vm7 = vweird.f32 %v2038_v38  ;;  %v899_v60 = vld [vmem:[#allocation2 + $0x1d0] sm:$0xff]  ;;  %v987_v59 = vld [vmem:[#allocation2 + $0x200] sm:$0xff] }
 0x4b5   :  { %v543_v8 = vpop.f32.mrf.mxu2  ;;  %880 = vmatpush.msra.mxu3 %v859_v49  ;;  %918 = vmatpush.msra.mxu0 %v899_v60  ;;  %v986_v60 = vld [vmem:[#allocation2 + $0x1f8] sm:$0xff] }
 0x4b6   :  { %786 = vmatpush.msrb.mxu2 %v761_v15  ;;  %v807_v40 = vsub.f32 1.0, %v806_v39  ;;  %v1989_v15 = vld [vmem:[#allocation2 + $0x168] ss:$0 sm:$0xff]  ;;  %v1992_v39 = vld [vmem:[#allocation2 + $0x1e0] ss:$0 sm:$0xff] }
 0x4b7   :  { %881 = vmatpush.msra.mxu3 %v858_v50  ;;  %919 = vmatpush.msra.mxu0 %v898_v61 }
 0x4b8   :  { %787 = vmatpush.msrb.mxu2 %v760_v17  ;;  %v808_v41 = vmul.f32 %v2038_v38, %v807_v40 }
 0x4b9   :  { %1899 = vmatmul.msk.f32.vlgmr.msrb.gmra.mxu3 %vm225_vm4, %v517_v0 }
 0x4ba   :  { %v809_v42 = vadd.f32 %v2038_v38, %v808_v41  ;;  %882 = vmatpush.msra.mxu3 %v857_v51 }
 0x4bc   :  { %v2325_v43 = vsel %vm810_vm7, %v2038_v38, %v809_v42  ;;  %883 = vmatpush.msra.mxu3 %v856_v53 }
 0x4f9   :  { %v595_v6 = vpop.f32.mrf.mxu0 }
 0x4fa   :  { %730 = vrot.lane.b32.xlu0 %v595_v6, %s2115_s21  ;;  %v897_v6 = vld [vmem:[#allocation2 + $0x1c0] sm:$0xff] }
 0x4fb   :  { %920 = vmatpush.msra.mxu0 %v897_v6 }
 0x521   :  { %v621_v7 = vpop.f32.mrf.mxu1 }
 0x522   :  { %v699_v52 = vpop.f32.mrf.mxu0 }
 0x523   :  { %746 = vrot.lane.b32.xlu0 %v699_v52, %s2121_s7 }
 0x531   :  { %v725_v9 = vpop.f32.mrf.mxu1 }
 0x532   :  { %748 = vrot.lane.b32.xlu2 %v725_v9, %s2121_s7  ;;  %v896_v9 = vld [vmem:[#allocation2 + $0x1b8] sm:$0xff] }
 0x533   :  { %921 = vmatpush.msra.mxu0 %v896_v9 }
 0x534   :  { %v569_v10 = vpop.f32.mrf.mxu3  ;;  %v647_v11 = vpop.f32.mrf.mxu2 }
 0x535   :  { %738 = vrot.lane.b32.xlu1 %v647_v11, %s2122_s8 }
 0x53c   :  { %v673_v12 = vpop.f32.mrf.mxu3 }
 0x53d   :  { %732 = vrot.lane.b32.xlu1 %v621_v7, %s2115_s21  ;;  %740 = vrot.lane.b32.xlu0 %v673_v12, %s2122_s8 }
 0x56c   :  { %v731_v18 = vpop.permute.xlu0 %730 }
 0x56d   :  { %v752_v19 = vsel %vm225_vm4, %v543_v8, %v731_v18 }
 0x58c   :  { %v749_v26 = vpop.permute.xlu2 %748 }
 0x595   :  { %v747_v1 = vpop.permute.xlu0 %746 }
 0x5a7   :  { %v739_v2 = vpop.permute.xlu1 %738 }
 0x5a8   :  { %v755_v20 = vsel %vm754_vm5, %v752_v19, %v739_v2  ;;  %v1990_v2 = vld [vmem:[#allocation2 + $0x170] ss:$0 sm:$0xff] }
 0x5a9   :  { %v758_v22 = vsel %vm757_vm6, %v755_v20, %v747_v1 }
 0x5aa   :  { %1902 = vmatmul.msk.f32.vlgmr.msrb.gmra.mxu2 %vm175_vm3, %v758_v22 }
 0x5af   :  { %v733_v23 = vpop.permute.xlu1 %732  ;;  %v741_v24 = vpop.permute.xlu0 %740 }
 0x5b0   :  { %v753_v25 = vsel %vm225_vm4, %v569_v10, %v733_v23 }
 0x5b1   :  { %v756_v27 = vsel %vm754_vm5, %v753_v25, %v741_v24 }
 0x5b2   :  { %v759_v28 = vsel %vm757_vm6, %v756_v27, %v749_v26 }
 0x5b3   :  { %1903 = vmatmul.msk.f32.gmra.mxu2 %vm175_vm3, %v759_v28 }
 0x62d   :  { %v789_v30 = vpop.f32.mrf.mxu2 }
 0x62e   :  { %v790_v4 = vadd.f32 %v1988_v29, %v789_v30  ;;  %v895_v30 = vld [vmem:[#allocation2 + $0x1b0] sm:$0xff] }
 0x62f   :  { %922 = vmatpush.msra.mxu0 %v895_v30  ;;  %v1995_v30 = vld [vmem:[#allocation2 + $0x218] ss:$0 sm:$0xff] }
 0x630   :  { %v795_v31 = vadd.f32 %v790_v4, %v2164_v55  ;;  %v894_v4 = vld [vmem:[#allocation2 + $0x1a8] sm:$0xff] }
 0x631   :  { %923 = vmatpush.msra.mxu0 %v894_v4 }
 0x632   :  { %v799_v32 = vsel %vm175_vm3, %v795_v31, 0.0 }
 0x633   :  { %800 = vadd.xlane.f32.xlu1 %v799_v32  ;;  %v1991_v32 = vld [vmem:[#allocation2 + $0x198] ss:$0 sm:$0xff] }
 0x636   :  { %v792_v33 = vpop.f32.mrf.mxu2 }
 0x637   :  { %v793_v34 = vadd.f32 %v1988_v29, %v792_v33 }
 0x639   :  { %v796_v35 = vadd.f32 %v793_v34, %v2171_v58 }
 0x63b   :  { %v802_v36 = vsel %vm175_vm3, %v796_v35, 0.0 }
 0x63c   :  { %803 = vadd.xlane.f32.xlu0 %v802_v36 }
 0x6a6   :  { %v801_v55 = vpop.xlane.xlu1 %800 }
 0x6a7   :  { %v812_v63 = vmul.f32 %v2325_v43, %v801_v55 }
 0x6a9   :  { %v814_v3 = vsub.f32 %v795_v31, %v812_v63  ;;  %v893_v31 = vld [vmem:[#allocation2 + $0x1a0] sm:$0xff] }
 0x6aa   :  { %924 = vmatpush.msra.mxu0 %v893_v31 }
 0x6ab   :  { %v816_v5 = vmul.f32 %v814_v3, %v814_v3 }
 0x6ad   :  { %v818_v58 = vsel %vm175_vm3, %v816_v5, 0.0 }
 0x6ae   :  { %819 = vadd.xlane.f32.xlu2 %v818_v58 }
 0x6af   :  { %v804_v44 = vpop.xlane.xlu0 %803 }
 0x6b0   :  { %v813_v45 = vmul.f32 %v2325_v43, %v804_v44 }
 0x6b2   :  { %v815_v46 = vsub.f32 %v796_v35, %v813_v45 }
 0x6b4   :  { %v817_v47 = vmul.f32 %v815_v46, %v815_v46 }
 0x6b6   :  { %v821_v48 = vsel %vm175_vm3, %v817_v47, 0.0 }
 0x6b7   :  { %822 = vadd.xlane.f32.xlu1 %v821_v48 }
 0x721   :  { %v820_v54 = vpop.xlane.xlu2 %819 }
 0x722   :  { %v824_v56 = vmul.f32 %v820_v54, %v2325_v43 }
 0x724   :  { %v826_v57 = vadd.f32 1e-05, %v824_v56  ;;  %v989_v56 = vld [vmem:[#allocation2 + $0x210] sm:$0xff] }
 0x725   :  { %1010 = vmatpush.msrb.mxu1 %v989_v56 }
 0x726   :  { %2039 = vrsqrt.f32 %v826_v57  ;;  %vm834_vm9 = vweird.f32 %v826_v57 }
 0x72a   :  { %v823_v62 = vpop.xlane.xlu1 %822 }
 0x72b   :  { %v825_v0 = vmul.f32 %v823_v62, %v2325_v43 }
 0x72c   :  { %v2040_v52 = vpop.eup %2039 }
 0x72d   :  { %v829_v7 = vmul.f32 %v2040_v52, %v826_v57  ;;  %v827_v8 = vadd.f32 1e-05, %v825_v0  ;;  %vm835_vm8 = vweird.f32 %v2040_v52  ;;  %v988_v57 = vld [vmem:[#allocation2 + $0x208] sm:$0xff] }
 0x72e   :  { %vm836_vm10 = vmor %vm834_vm9, %vm835_vm8  ;;  %1011 = vmatpush.msrb.mxu1 %v988_v57 }
 0x72f   :  { %v830_v10 = vmul.f32 %v2040_v52, %v829_v7  ;;  %2041 = vrsqrt.f32 %v827_v8  ;;  %vm844_vm12 = vweird.f32 %v827_v8 }
 0x730   :  { %1012 = vmatpush.msrb.mxu1 %v987_v59 }
 0x731   :  { %v831_v11 = vmul.f32 0.5, %v830_v10 }
 0x732   :  { %1013 = vmatpush.msrb.mxu1 %v986_v60 }
 0x733   :  { %v832_v12 = vsub.f32 1.5, %v831_v11 }
 0x735   :  { %v2042_v13 = vpop.eup %2041  ;;  %v833_v14 = vmul.f32 %v2040_v52, %v832_v12 }
 0x736   :  { %v839_v17 = vmul.f32 %v2042_v13, %v827_v8  ;;  %vm845_vm11 = vweird.f32 %v2042_v13 }
 0x737   :  { %v837_v18 = vsel %vm836_vm10, %v2040_v52, %v833_v14  ;;  %vm846_vm13 = vmor %vm844_vm12, %vm845_vm11 }
 0x738   :  { %v848_v19 = vmul.f32 %v837_v18, %v814_v3  ;;  %v840_v1 = vmul.f32 %v2042_v13, %v839_v17 }
 0x73a   :  { %v851_v20 = vmul.f32 %v1989_v15, %v848_v19  ;;  %v841_v22 = vmul.f32 0.5, %v840_v1 }
 0x73c   :  { %v842_v23 = vsub.f32 1.5, %v841_v22  ;;  %v854_v24 = vadd.f32 %v1990_v2, %v851_v20 }
 0x73e   :  { %v843_v25 = vmul.f32 %v2042_v13, %v842_v23  ;;  %1904 = vmatmul.msk.f32.vlgmr.msra.gmra.mxu3 %vm175_vm3, %v854_v24 }
 0x740   :  { %v847_v26 = vsel %vm846_vm13, %v2042_v13, %v843_v25 }
 0x741   :  { %v849_v27 = vmul.f32 %v847_v26, %v815_v46 }
 0x743   :  { %v852_v28 = vmul.f32 %v1989_v15, %v849_v27  ;;  %v1993_v15 = vld [vmem:[#allocation2 + $0x1e8] ss:$0 sm:$0xff] }
 0x745   :  { %v855_v29 = vadd.f32 %v1990_v2, %v852_v28  ;;  %v1994_v2 = vld [vmem:[#allocation2 + $0x1f0] ss:$0 sm:$0xff] }
 0x747   :  { %1905 = vmatmul.msk.f32.gmra.mxu3 %vm175_vm3, %v855_v29 }
 0x7c1   :  { %v885_v33 = vpop.f32.mrf.mxu3 }
 0x7c2   :  { %v886_v34 = vadd.f32 %v1991_v32, %v885_v33 }
 0x7c4   :  { %v891_v35 = vmax.f32 %v886_v34, 0.0 }
 0x7c6   :  { %1906 = vmatmul.msk.f32.vlgmr.msra.gmra.mxu0 %vm135_vm2, %v891_v35 }
 0x7ca   :  { %v888_v36 = vpop.f32.mrf.mxu3 }
 0x7cb   :  { %v889_v37 = vadd.f32 %v1991_v32, %v888_v36 }
 0x7cd   :  { %v892_v38 = vmax.f32 %v889_v37, 0.0 }
 0x7cf   :  { %1907 = vmatmul.msk.f32.gmra.mxu0 %vm135_vm2, %v892_v38 }
 0x843   :  { %v926_v40 = vpop.f32.mrf.mxu0 }
 0x844   :  { %v927_v41 = vadd.f32 %v1992_v39, %v926_v40 }
 0x846   :  { %v932_v42 = vadd.f32 %v927_v41, %v854_v24 }
 0x848   :  { %v936_v55 = vsel %vm175_vm3, %v932_v42, 0.0 }
 0x849   :  { %937 = vadd.xlane.f32.xlu0 %v936_v55 }
 0x84c   :  { %v929_v63 = vpop.f32.mrf.mxu0 }
 0x84d   :  { %v930_v3 = vadd.f32 %v1992_v39, %v929_v63 }
 0x84f   :  { %v933_v5 = vadd.f32 %v930_v3, %v855_v29 }
 0x851   :  { %v939_v58 = vsel %vm175_vm3, %v933_v5, 0.0 }
 0x852   :  { %940 = vadd.xlane.f32.xlu2 %v939_v58 }
 0x8bc   :  { %v938_v44 = vpop.xlane.xlu0 %937 }
 0x8bd   :  { %v942_v45 = vmul.f32 %v938_v44, %v2325_v43 }
 0x8bf   :  { %v944_v46 = vsub.f32 %v932_v42, %v942_v45 }
 0x8c1   :  { %v946_v47 = vmul.f32 %v944_v46, %v944_v46 }
 0x8c3   :  { %v948_v48 = vsel %vm175_vm3, %v946_v47, 0.0 }
 0x8c4   :  { %949 = vadd.xlane.f32.xlu1 %v948_v48 }
 0x8c5   :  { %v941_v49 = vpop.xlane.xlu2 %940 }
 0x8c6   :  { %v943_v50 = vmul.f32 %v941_v49, %v2325_v43 }
 0x8c8   :  { %v945_v51 = vsub.f32 %v933_v5, %v943_v50 }
 0x8ca   :  { %v947_v53 = vmul.f32 %v945_v51, %v945_v51 }
 0x8cc   :  { %v951_v54 = vsel %vm175_vm3, %v947_v53, 0.0 }
 0x8cd   :  { %952 = vadd.xlane.f32.xlu0 %v951_v54 }
 0x937   :  { %v950_v61 = vpop.xlane.xlu1 %949 }
 0x938   :  { %v954_v62 = vmul.f32 %v950_v61, %v2325_v43 }
 0x93a   :  { %v956_v0 = vadd.f32 1e-05, %v954_v62 }
 0x93c   :  { %2043 = vrsqrt.f32 %v956_v0  ;;  %vm964_vm15 = vweird.f32 %v956_v0 }
 0x940   :  { %v953_v6 = vpop.xlane.xlu0 %952 }
 0x941   :  { %v955_v52 = vmul.f32 %v953_v6, %v2325_v43 }
 0x942   :  { %v2044_v7 = vpop.eup %2043 }
 0x943   :  { %v959_v8 = vmul.f32 %v2044_v7, %v956_v0  ;;  %v957_v9 = vadd.f32 1e-05, %v955_v52  ;;  %vm965_vm14 = vweird.f32 %v2044_v7 }
 0x944   :  { %vm966_vm0 = vmor %vm964_vm15, %vm965_vm14 }
 0x945   :  { %v960_v10 = vmul.f32 %v2044_v7, %v959_v8  ;;  %2045 = vrsqrt.f32 %v957_v9  ;;  %vm974_vm7 = vweird.f32 %v957_v9 }
 0x947   :  { %v961_v11 = vmul.f32 0.5, %v960_v10 }
 0x949   :  { %v962_v12 = vsub.f32 1.5, %v961_v11 }
 0x94b   :  { %v2046_v13 = vpop.eup %2045  ;;  %v963_v14 = vmul.f32 %v2044_v7, %v962_v12 }
 0x94c   :  { %v969_v17 = vmul.f32 %v2046_v13, %v957_v9  ;;  %vm975_vm1 = vweird.f32 %v2046_v13 }
 0x94d   :  { %v967_v18 = vsel %vm966_vm0, %v2044_v7, %v963_v14  ;;  %vm976_vm8 = vmor %vm974_vm7, %vm975_vm1 }
 0x94e   :  { %v978_v19 = vmul.f32 %v967_v18, %v944_v46  ;;  %v970_v1 = vmul.f32 %v2046_v13, %v969_v17 }
 0x950   :  { %v981_v20 = vmul.f32 %v1993_v15, %v978_v19  ;;  %v971_v22 = vmul.f32 0.5, %v970_v1 }
 0x952   :  { %v972_v23 = vsub.f32 1.5, %v971_v22  ;;  %v2345_v24 = vadd.f32 %v1994_v2, %v981_v20 }
 0x954   :  { %v973_v25 = vmul.f32 %v2046_v13, %v972_v23  ;;  %1908 = vmatmul.msk.f32.vlgmr.msrb.gmra.mxu1 %vm175_vm3, %v2345_v24 }
 0x956   :  { %v977_v26 = vsel %vm976_vm8, %v2046_v13, %v973_v25 }
 0x957   :  { %v979_v27 = vmul.f32 %v977_v26, %v945_v51 }
 0x959   :  { %v982_v28 = vmul.f32 %v1993_v15, %v979_v27 }
 0x95b   :  { %v2349_v29 = vadd.f32 %v1994_v2, %v982_v28 }
 0x95d   :  { %1909 = vmatmul.msk.f32.gmra.mxu1 %vm175_vm3, %v2349_v29 }
 0x9d1   :  { %v1015_v4 = vpop.f32.mrf.mxu1 }
 0x9d2   :  { %v2353_v31 = vadd.f32 %v1995_v30, %v1015_v4 }
 0x9d4   :  { %1023 = vrot.lane.b32.xlu0 %v2353_v31, %s2117_s29  ;;  %1027 = vrot.lane.b32.xlu2 %v2353_v31, %s2118_s1 }
 0x9da   :  { %v1018_v32 = vpop.f32.mrf.mxu1 }
 0x9db   :  { %v2359_v33 = vadd.f32 %v1995_v30, %v1018_v32 }
 0x9dc   :  { %1031 = vrot.lane.b32.xlu0 %v2353_v31, %s2116_s28 }
 0x9dd   :  { %1033 = vrot.lane.b32.xlu2 %v2359_v33, %s2116_s28  ;;  %1025 = vrot.lane.b32.xlu1 %v2359_v33, %s2117_s29 }
 0x9e4   :  { %1061 = vrot.lane.b32.xlu0 %v2359_v33, %s2119_s30 }
 0x9e5   :  { %1035 = vrot.lane.b32.xlu2 %v2353_v31, %s2119_s30  ;;  %1029 = vrot.lane.b32.xlu1 %v2359_v33, %s2118_s1 }
 0xa2e   :  { %v2373_v34 = vpop.permute.xlu2 %1027 }
 0xa2f   :  { %1139 = vrot.lane.b32.xlu1 %v2373_v34, %s2119_s30 }
 0xa37   :  { %v2377_v35 = vpop.permute.xlu2 %1033 }
 0xa38   :  { %1217 = vrot.lane.b32.xlu1 %v2377_v35, %s2119_s30 }
 0xa3f   :  { %v1036_v36 = vpop.permute.xlu2 %1035 }
 0xa40   :  { %1910 = vmatpush.xpose.msk.msra.mxu2 %vm225_vm4, %v1036_v36 }
 0xa43   :  { %1911 = vmatmul.msk.f32.vlgmr.msra.gmra.mxu2 %vm225_vm4, %v2353_v31 }
 0xa46   :  { %v2384_v37 = vpop.permute.xlu0 %1023 }
 0xa47   :  { %1087 = vrot.lane.b32.xlu0 %v2384_v37, %s2119_s30  ;;  %v1970_v18 = vpack.i.bf16 %v2384_v37, %v2353_v31 }
 0xa4e   :  { %v2388_v38 = vpop.permute.xlu0 %1031 }
 0xa4f   :  { %v2390_v39 = vpop.permute.xlu1 %1025 }
 0xa50   :  { %1113 = vrot.lane.b32.xlu2 %v2390_v39, %s2119_s30 }
 0xa56   :  { %v1062_v40 = vpop.permute.xlu0 %1061 }
 0xa57   :  { %v2394_v41 = vpop.permute.xlu1 %1029  ;;  %1912 = vmatpush.xpose.msk.msrb.mxu3 %vm225_vm4, %v1062_v40 }
 0xa58   :  { %1165 = vrot.lane.b32.xlu0 %v2394_v41, %s2119_s30  ;;  %1191 = vrot.lane.b32.xlu2 %v2388_v38, %s2119_s30 }
 0xa5a   :  { %1913 = vmatmul.msk.f32.vlgmr.msrb.gmra.mxu3 %vm225_vm4, %v2359_v33 }
 0xaa1   :  { %v1140_v42 = vpop.permute.xlu1 %1139 }
 0xaa2   :  { %1918 = vmatpush.xpose.msk.msra.mxu3 %vm225_vm4, %v1140_v42 }
 0xaa5   :  { %1919 = vmatmul.msk.f32.vlgmr.msra.gmra.mxu3 %vm225_vm4, %v2373_v34 }
 0xaaa   :  { %v1114_v55 = vpop.permute.xlu2 %1113  ;;  %v1218_v63 = vpop.permute.xlu1 %1217 }
 0xaab   :  { %1916 = vmatpush.xpose.msk.msrb.mxu2 %vm225_vm4, %v1114_v55 }
 0xaae   :  { %1917 = vmatmul.msk.f32.vlgmr.msrb.gmra.mxu2 %vm225_vm4, %v2390_v39 }
 0xaaf   :  { %1924 = vmatpush.xpose.msk.msra.mxu2 %vm225_vm4, %v1218_v63 }
 0xab2   :  { %v1192_v5 = vpop.permute.xlu2 %1191 }
 0xab6   :  { %1925 = vmatmul.msk.f32.vlgmr.msra.gmra.mxu2 %vm225_vm4, %v2377_v35 }
 0xab9   :  { %v1088_v3 = vpop.permute.xlu0 %1087 }
 0xaba   :  { %1914 = vmatpush.xpose.msk.msra.mxu1 %vm225_vm4, %v1088_v3 }
 0xabd   :  { %1915 = vmatmul.msk.f32.vlgmr.msra.gmra.mxu1 %vm225_vm4, %v2384_v37 }
 0xabe   :  { %1922 = vmatpush.xpose.msk.msrb.mxu1 %vm225_vm4, %v1192_v5 }
 0xac5   :  { %1923 = vmatmul.msk.f32.vlgmr.msrb.gmra.mxu1 %vm225_vm4, %v2388_v38 }
 0xac6   :  { %v1058_v58 = vpop.f32.mrf.mxu2 }
 0xac7   :  { %v1059_v44 = vadd.f32 %v1058_v58, %v2246_v16 }
 0xac9   :  { %v1243_v45 = vsel %vm225_vm4, %v1059_v44, -inf }
 0xaca   :  { %1244 = vmax.xlane.f32.xlu1 %v1243_v45  ;;  %v1166_v46 = vpop.permute.xlu0 %1165 }
 0xacb   :  { %1920 = vmatpush.xpose.msk.msrb.mxu0 %vm225_vm4, %v1166_v46 }
 0xace   :  { %1921 = vmatmul.msk.f32.vlgmr.msrb.gmra.mxu0 %vm225_vm4, %v2394_v41 }
 0xadd   :  { %v1084_v47 = vpop.f32.mrf.mxu3 }
 0xade   :  { %v1085_v48 = vadd.f32 %v1084_v47, %v2250_v21 }
 0xae0   :  { %v1246_v49 = vsel %vm225_vm4, %v1085_v48, -inf }
 0xae1   :  { %1247 = vmax.xlane.f32.xlu2 %v1246_v49 }
 0xb28   :  { %v1162_v50 = vpop.f32.mrf.mxu3 }
 0xb29   :  { %v1163_v51 = vadd.f32 %v1162_v50, %v2246_v16 }
 0xb2b   :  { %v1255_v53 = vsel %vm225_vm4, %v1163_v51, -inf }
 0xb2c   :  { %1256 = vmax.xlane.f32.xlu0 %v1255_v53 }
 0xb31   :  { %v1136_v54 = vpop.f32.mrf.mxu2 }
 0xb32   :  { %v1137_v56 = vadd.f32 %v1136_v54, %v2250_v21 }
 0xb34   :  { %v1252_v57 = vsel %vm225_vm4, %v1137_v56, -inf }
 0xb35   :  { %1253 = vmax.xlane.f32.xlu1 %v1252_v57 }
 0xb39   :  { %v1240_v59 = vpop.f32.mrf.mxu2 }
 0xb3a   :  { %v2430_v60 = vadd.f32 %v1240_v59, %v2250_v21  ;;  %v1110_v61 = vpop.f32.mrf.mxu1 }
 0xb3b   :  { %v1111_v62 = vadd.f32 %v1110_v61, %v2246_v16 }
 0xb3c   :  { %v1264_v0 = vsel %vm225_vm4, %v2430_v60, -inf }
 0xb3d   :  { %1265 = vmax.xlane.f32.xlu1 %v1264_v0  ;;  %v1245_v6 = vpop.xlane.xlu1 %1244  ;;  %v1249_v52 = vsel %vm225_vm4, %v1111_v62, -inf }
 0xb3e   :  { %v1267_v7 = vsub.f32 %v1059_v44, %v1245_v6  ;;  %1250 = vmax.xlane.f32.xlu2 %v1249_v52  ;;  %v1975_v6 = vpack.i.bf16 %v2390_v39, %v2373_v34 }
 0xb40   :  { %v1275_v8 = vmul.f32 1.442695, %v1267_v7 }
 0xb42   :  { %v1214_v9 = vpop.f32.mrf.mxu1  ;;  %2047 = vpow2.f32 %v1275_v8 }
 0xb43   :  { %v1215_v10 = vadd.f32 %v1214_v9, %v2246_v16 }
 0xb45   :  { %v1261_v11 = vsel %vm225_vm4, %v1215_v10, -inf }
 0xb46   :  { %1262 = vmax.xlane.f32.xlu0 %v1261_v11 }
 0xb48   :  { %v2048_v12 = vpop.eup %2047 }
 0xb49   :  { %v1291_v15 = vsel %vm225_vm4, %v2048_v12, 0.0 }
 0xb4b   :  { %v1188_v13 = vpop.f32.mrf.mxu0 }
 0xb4c   :  { %v1189_v14 = vadd.f32 %v1188_v13, %v2250_v21 }
 0xb4e   :  { %1292 = vadd.xlane.f32.xlu0 %v1291_v15  ;;  %v1258_v17 = vsel %vm225_vm4, %v1189_v14, -inf }
 0xb4f   :  { %1259 = vmax.xlane.f32.xlu2 %v1258_v17 }
 0xb54   :  { %v1248_v19 = vpop.xlane.xlu2 %1247 }
 0xb55   :  { %v1268_v1 = vsub.f32 %v1085_v48, %v1248_v19 }
 0xb56   :  { %1971 = vrot.lane.b32.xlu1 %v1970_v18, %s2120_s2 }
 0xb57   :  { %v1277_v16 = vmul.f32 1.442695, %v1268_v1 }
 0xb59   :  { %2049 = vpow2.f32 %v1277_v16 }
 0xb5f   :  { %v2444_v2 = vpop.eup %2049 }
 0xb60   :  { %v1294_v21 = vsel %vm225_vm4, %v2444_v2, 0.0 }
 0xb61   :  { %1295 = vadd.xlane.f32.xlu2 %v1294_v21 }
 0xb9f   :  { %v1257_v20 = vpop.xlane.xlu0 %1256 }
 0xba0   :  { %v1271_v22 = vsub.f32 %v1163_v51, %v1257_v20 }
 0xba2   :  { %v1283_v23 = vmul.f32 1.442695, %v1271_v22 }
 0xba4   :  { %2051 = vpow2.f32 %v1283_v23 }
 0xba8   :  { %v1254_v4 = vpop.xlane.xlu1 %1253 }
 0xba9   :  { %v1270_v37 = vsub.f32 %v1137_v56, %v1254_v4 }
 0xbaa   :  { %v2448_v25 = vpop.eup %2051 }
 0xbab   :  { %v1303_v26 = vsel %vm225_vm4, %v2448_v25, 0.0  ;;  %v1281_v55 = vmul.f32 1.442695, %v1270_v37 }
 0xbac   :  { %1304 = vadd.xlane.f32.xlu2 %v1303_v26 }
 0xbb0   :  { %v1266_v63 = vpop.xlane.xlu1 %1265 }
 0xbb1   :  { %v1251_v27 = vpop.xlane.xlu2 %1250  ;;  %v1274_v45 = vsub.f32 %v2430_v60, %v1266_v63  ;;  %v1570_v63 = vld [vmem:[#allocation2 + $0x228] sm:$0xff] }
 0xbb2   :  { %v1269_v28 = vsub.f32 %v1111_v62, %v1251_v27  ;;  %v1980_v62 = vpack.i.bf16 %v2388_v38, %v2359_v33 }
 0xbb3   :  { %v1289_v50 = vmul.f32 1.442695, %v1274_v45 }
 0xbb4   :  { %v1279_v30 = vmul.f32 1.442695, %v1269_v28 }
 0xbb6   :  { %2053 = vpow2.f32 %v1279_v30 }
 0xbb9   :  { %v1263_v31 = vpop.xlane.xlu0 %1262 }
 0xbba   :  { %v1273_v32 = vsub.f32 %v1215_v10, %v1263_v31 }
 0xbbc   :  { %v2054_v36 = vpop.eup %2053  ;;  %v1287_v40 = vmul.f32 1.442695, %v1273_v32 }
 0xbbd   :  { %v1297_v42 = vsel %vm225_vm4, %v2054_v36, 0.0 }
 0xbbe   :  { %2055 = vpow2.f32 %v1287_v40  ;;  %1298 = vadd.xlane.f32.xlu1 %v1297_v42  ;;  %v1572_v42 = vld [vmem:[#allocation2 + $0x238] sm:$0xff] }
 0xbc1   :  { %v1293_v3 = vpop.xlane.xlu0 %1292 }
 0xbc2   :  { %2057 = vrcp.f32 %v1293_v3  ;;  %v1260_v5 = vpop.xlane.xlu2 %1259  ;;  %v1569_v3 = vld [vmem:[#allocation2 + $0x220] sm:$0xff] }
 0xbc3   :  { %v1272_v58 = vsub.f32 %v1189_v14, %v1260_v5  ;;  %2059 = vpow2.f32 %v1281_v55  ;;  %v1571_v55 = vld [vmem:[#allocation2 + $0x230] sm:$0xff] }
 0xbc4   :  { %v2056_v44 = vpop.eup %2055 }
 0xbc5   :  { %v1285_v46 = vmul.f32 1.442695, %v1272_v58  ;;  %v1309_v47 = vsel %vm225_vm4, %v2056_v44, 0.0 }
 0xbc6   :  { %1310 = vadd.xlane.f32.xlu0 %v1309_v47 }
 0xbc7   :  { %2061 = vpow2.f32 %v1285_v46 }
 0xbc8   :  { %v2058_v48 = vpop.eup %2057  ;;  %v1972_v49 = vpop.permute.xlu1 %1971  ;;  %2063 = vpow2.f32 %v1289_v50 }
 0xbc9   :  { %v1323_v51 = vmul.f32 %v2058_v48, %v2048_v12  ;;  %v1974_v53 = vunpack.i.h.bf16 %v1972_v49  ;;  %v1973_v54 = vunpack.i.l.bf16 %v1972_v49  ;;  %v2060_v56 = vpop.eup %2059 }
 0xbca   :  { %v1300_v59 = vsel %vm225_vm4, %v2060_v56, 0.0 }
 0xbcb   :  { %1352 = vmatpush.msrb.mxu3 %v1973_v54  ;;  %1404 = vmatpush.msra.mxu1 %v1974_v53 }
 0xbcc   :  { %1926 = vmatmul.msk.f32.vlgmr.msrb.gmra.mxu3 %vm225_vm4, %v1323_v51 }
 0xbcd   :  { %v2062_v57 = vpop.eup %2061 }
 0xbce   :  { %1301 = vadd.xlane.f32.xlu0 %v1300_v59  ;;  %v1306_v60 = vsel %vm225_vm4, %v2062_v57, 0.0  ;;  %v2064_v61 = vpop.eup %2063 }
 0xbcf   :  { %1307 = vadd.xlane.f32.xlu2 %v1306_v60  ;;  %v1312_v0 = vsel %vm225_vm4, %v2064_v61, 0.0 }
 0xbd4   :  { %v1296_v7 = vpop.xlane.xlu2 %1295 }
 0xbd7   :  { %1981 = vrot.lane.b32.xlu1 %v1980_v62, %s2120_s2  ;;  %1313 = vadd.xlane.f32.xlu2 %v1312_v0 }
 0xbdf   :  { %1461 = vrot.lane.b32.xlu1 %v2394_v41, %s2120_s2 }
 0xbe2   :  { %1976 = vrot.lane.b32.xlu0 %v1975_v6, %s2120_s2 }
 0xbef   :  { %1513 = vrot.lane.b32.xlu2 %v2377_v35, %s2120_s2 }
 0xc1f   :  { %v1305_v8 = vpop.xlane.xlu2 %1304 }
 0xc31   :  { %v1299_v52 = vpop.xlane.xlu1 %1298 }
 0xc32   :  { %2065 = vrcp.f32 %v1299_v52 }
 0xc33   :  { %2067 = vrcp.f32 %v1296_v7 }
 0xc38   :  { %v2066_v33 = vpop.eup %2065 }
 0xc39   :  { %v1325_v38 = vmul.f32 %v2066_v33, %v2054_v36  ;;  %v1311_v9 = vpop.xlane.xlu0 %1310  ;;  %v2068_v10 = vpop.eup %2067 }
 0xc3a   :  { %2069 = vrcp.f32 %v1311_v9  ;;  %v1324_v35 = vmul.f32 %v2068_v10, %v2444_v2 }
 0xc3b   :  { %1928 = vmatmul.msk.f32.vlgmr.msra.gmra.mxu1 %vm225_vm4, %v1325_v38 }
 0xc40   :  { %v2070_v11 = vpop.eup %2069 }
 0xc41   :  { %v1302_v39 = vpop.xlane.xlu0 %1301  ;;  %v1329_v14 = vmul.f32 %v2070_v11, %v2056_v44 }
 0xc42   :  { %v1308_v41 = vpop.xlane.xlu2 %1307 }
 0xc43   :  { %2071 = vrcp.f32 %v1308_v41 }
 0xc44   :  { %2073 = vrcp.f32 %v1305_v8 }
 0xc45   :  { %2075 = vrcp.f32 %v1302_v39  ;;  %v1660_v39 = vld [vmem:[#allocation2 + $0x268] sm:$0xff] }
 0xc49   :  { %v1982_v34 = vpop.permute.xlu1 %1981  ;;  %v2072_v17 = vpop.eup %2071 }
 0xc4a   :  { %v1984_v12 = vunpack.i.h.bf16 %v1982_v34  ;;  %v1983_v13 = vunpack.i.l.bf16 %v1982_v34  ;;  %v1314_v15 = vpop.xlane.xlu2 %1313  ;;  %v2074_v19 = vpop.eup %2073  ;;  %v1328_v16 = vmul.f32 %v2072_v17, %v2062_v57  ;;  %v1702_v17 = vld [vmem:[#allocation2 + $0x2b8] sm:$0xff] }
 0xc4b   :  { %v2076_v1 = vpop.eup %2075  ;;  %2077 = vrcp.f32 %v1314_v15  ;;  %v1327_v22 = vmul.f32 %v2074_v19, %v2448_v25  ;;  %v1700_v19 = vld [vmem:[#allocation2 + $0x2a8] sm:$0xff] }
 0xc4c   :  { %1378 = vmatpush.msra.mxu0 %v1983_v13  ;;  %1508 = vmatpush.msrb.mxu1 %v1984_v12  ;;  %v1326_v23 = vmul.f32 %v2076_v1, %v2060_v56  ;;  %v1996_v56 = vld [vmem:[#allocation2 + $0x240] ss:$0 sm:$0xff]  ;;  %v1658_v13 = vld [vmem:[#allocation2 + $0x258] sm:$0xff] }
 0xc4d   :  { %1927 = vmatmul.msk.f32.vlgmr.msra.gmra.mxu0 %vm225_vm4, %v1324_v35  ;;  %1932 = vmatmul.msk.f32.vlgmr.msrb.gmra.mxu1 %vm225_vm4, %v1329_v14  ;;  %v1659_v12 = vld [vmem:[#allocation2 + $0x260] sm:$0xff] }
 0xc4e   :  { %1719 = vmatpush.msra.mxu1 %v1702_v17 }
 0xc4f   :  { %v1354_v32 = vpop.f32.mrf.mxu3 }
 0xc51   :  { %v1462_v18 = vpop.permute.xlu1 %1461  ;;  %v2078_v27 = vpop.eup %2077 }
 0xc52   :  { %1482 = vmatpush.msrb.mxu0 %v1462_v18  ;;  %v1514_v26 = vpop.permute.xlu2 %1513  ;;  %v1330_v28 = vmul.f32 %v2078_v27, %v2064_v61  ;;  %v1701_v18 = vld [vmem:[#allocation2 + $0x2b0] sm:$0xff] }
 0xc53   :  { %1720 = vmatpush.msra.mxu1 %v1701_v18 }
 0xc54   :  { %v1977_v21 = vpop.permute.xlu0 %1976 }
 0xc55   :  { %v1979_v20 = vunpack.i.h.bf16 %v1977_v21  ;;  %v1978_v2 = vunpack.i.l.bf16 %v1977_v21  ;;  %1931 = vmatmul.msk.f32.vlgmr.msrb.gmra.mxu0 %vm225_vm4, %v1328_v16  ;;  %v1699_v21 = vld [vmem:[#allocation2 + $0x2a0] sm:$0xff]  ;;  %1721 = vmatpush.msra.mxu1 %v1700_v19 }
 0xc57   :  { %1430 = vmatpush.msrb.mxu2 %v1979_v20  ;;  %1456 = vmatpush.msra.mxu3 %v1978_v2 }
 0xc58   :  { %1929 = vmatmul.msk.f32.vlgmr.msrb.gmra.mxu2 %vm225_vm4, %v1326_v23  ;;  %1930 = vmatmul.msk.f32.vlgmr.msra.gmra.mxu3 %vm225_vm4, %v1327_v22  ;;  %v1698_v23 = vld [vmem:[#allocation2 + $0x298] sm:$0xff] }
 0xc59   :  { %1534 = vmatpush.msra.mxu2 %v1514_v26  ;;  %1593 = vmatpush.msrb.mxu3 %v1572_v42 }
 0xc5a   :  { %1722 = vmatpush.msra.mxu1 %v1699_v21  ;;  %v1830_v21 = vld [vmem:[#allocation2 + $0x328] sm:$0xff] }
 0xc5b   :  { %1594 = vmatpush.msrb.mxu3 %v1571_v55 }
 0xc5c   :  { %1723 = vmatpush.msra.mxu1 %v1698_v23 }
 0xc5d   :  { %1595 = vmatpush.msrb.mxu3 %v1570_v63 }
 0xc5f   :  { %1596 = vmatpush.msrb.mxu3 %v1569_v3 }
 0xc60   :  { %1933 = vmatmul.msk.f32.vlgmr.msra.gmra.mxu2 %vm225_vm4, %v1330_v28 }
 0xcb8   :  { %v1406_v30 = vpop.f32.mrf.mxu1 }
 0xcb9   :  { %1541 = vrot.lane.b32.xlu0 %v1406_v30, %s2115_s21 }
 0xcca   :  { %v1380_v4 = vpop.f32.mrf.mxu0  ;;  %v1510_v31 = vpop.f32.mrf.mxu1 }
 0xccb   :  { %1557 = vrot.lane.b32.xlu0 %v1510_v31, %s2121_s7  ;;  %v1997_v31 = vld [vmem:[#allocation2 + $0x248] ss:$0 sm:$0xff] }
 0xcd2   :  { %v1484_v25 = vpop.f32.mrf.mxu0 }
 0xcd3   :  { %1551 = vrot.lane.b32.xlu0 %v1484_v25, %s2122_s8 }
 0xcdb   :  { %v1432_v36 = vpop.f32.mrf.mxu2  ;;  %v1458_v37 = vpop.f32.mrf.mxu3 }
 0xcdc   :  { %1549 = vrot.lane.b32.xlu1 %v1458_v37, %s2122_s8 }
 0xce3   :  { %v1536_v40 = vpop.f32.mrf.mxu2 }
 0xce4   :  { %1559 = vrot.lane.b32.xlu2 %v1536_v40, %s2121_s7  ;;  %1543 = vrot.lane.b32.xlu1 %v1432_v36, %s2115_s21  ;;  %v1998_v40 = vld [vmem:[#allocation2 + $0x250] ss:$0 sm:$0xff] }
 0xd2b   :  { %v1542_v5 = vpop.permute.xlu0 %1541 }
 0xd2c   :  { %v1563_v44 = vsel %vm225_vm4, %v1354_v32, %v1542_v5 }
 0xd3d   :  { %v1558_v58 = vpop.permute.xlu0 %1557 }
 0xd3e   :  { %v1560_v51 = vpop.permute.xlu2 %1559 }
 0xd45   :  { %v1552_v49 = vpop.permute.xlu0 %1551 }
 0xd4e   :  { %v1550_v45 = vpop.permute.xlu1 %1549 }
 0xd4f   :  { %v1565_v46 = vsel %vm754_vm5, %v1563_v44, %v1550_v45 }
 0xd50   :  { %v1567_v47 = vsel %vm757_vm6, %v1565_v46, %v1558_v58 }
 0xd51   :  { %1934 = vmatmul.msk.f32.vlgmr.msrb.gmra.mxu3 %vm175_vm3, %v1567_v47  ;;  %v1697_v47 = vld [vmem:[#allocation2 + $0x290] sm:$0xff] }
 0xd52   :  { %1724 = vmatpush.msra.mxu1 %v1697_v47 }
 0xd56   :  { %v1544_v48 = vpop.permute.xlu1 %1543 }
 0xd57   :  { %v1564_v50 = vsel %vm225_vm4, %v1380_v4, %v1544_v48  ;;  %v1696_v48 = vld [vmem:[#allocation2 + $0x288] sm:$0xff] }
 0xd58   :  { %v1566_v53 = vsel %vm754_vm5, %v1564_v50, %v1552_v49  ;;  %1725 = vmatpush.msra.mxu1 %v1696_v48  ;;  %v1695_v49 = vld [vmem:[#allocation2 + $0x280] sm:$0xff]  ;;  %v1999_v50 = vld [vmem:[#allocation2 + $0x278] ss:$0 sm:$0xff] }
 0xd59   :  { %v1568_v54 = vsel %vm757_vm6, %v1566_v53, %v1560_v51 }
 0xd5a   :  { %1935 = vmatmul.msk.f32.gmra.mxu3 %vm175_vm3, %v1568_v54  ;;  %1726 = vmatpush.msra.mxu1 %v1695_v49  ;;  %v1827_v49 = vld [vmem:[#allocation2 + $0x310] sm:$0xff] }
 0xdd4   :  { %v1598_v57 = vpop.f32.mrf.mxu3 }
 0xdd5   :  { %v1599_v59 = vadd.f32 %v1996_v56, %v1598_v57 }
 0xdd7   :  { %v1604_v60 = vadd.f32 %v1599_v59, %v2345_v24 }
 0xdd9   :  { %v1608_v61 = vsel %vm175_vm3, %v1604_v60, 0.0 }
 0xdda   :  { %1609 = vadd.xlane.f32.xlu1 %v1608_v61 }
 0xddd   :  { %v1601_v62 = vpop.f32.mrf.mxu3 }
 0xdde   :  { %v1602_v0 = vadd.f32 %v1996_v56, %v1601_v62 }
 0xde0   :  { %v1605_v6 = vadd.f32 %v1602_v0, %v2349_v29  ;;  %v1661_v29 = vld [vmem:[#allocation2 + $0x270] sm:$0xff] }
 0xde1   :  { %1682 = vmatpush.msra.mxu0 %v1661_v29 }
 0xde2   :  { %v1611_v52 = vsel %vm175_vm3, %v1605_v6, 0.0 }
 0xde3   :  { %1612 = vadd.xlane.f32.xlu0 %v1611_v52  ;;  %1683 = vmatpush.msra.mxu0 %v1660_v39 }
 0xde5   :  { %1684 = vmatpush.msra.mxu0 %v1659_v12 }
 0xde7   :  { %1685 = vmatpush.msra.mxu0 %v1658_v13  ;;  %v1791_v13 = vld [vmem:[#allocation2 + $0x2f0] sm:$0xff] }
 0xde8   :  { %1812 = vmatpush.msrb.mxu2 %v1791_v13 }
 0xe4d   :  { %v1610_v7 = vpop.xlane.xlu1 %1609 }
 0xe4e   :  { %v1614_v33 = vmul.f32 %v1610_v7, %v2325_v43 }
 0xe50   :  { %v1616_v38 = vsub.f32 %v1604_v60, %v1614_v33  ;;  %v2000_v60 = vld [vmem:[#allocation2 + $0x2c0] ss:$0 sm:$0xff] }
 0xe52   :  { %v1618_v8 = vmul.f32 %v1616_v38, %v1616_v38 }
 0xe54   :  { %v1620_v9 = vsel %vm175_vm3, %v1618_v8, 0.0 }
 0xe55   :  { %1621 = vadd.xlane.f32.xlu2 %v1620_v9 }
 0xe56   :  { %v1613_v41 = vpop.xlane.xlu0 %1612 }
 0xe57   :  { %v1615_v24 = vmul.f32 %v1613_v41, %v2325_v43 }
 0xe59   :  { %v1617_v10 = vsub.f32 %v1605_v6, %v1615_v24 }
 0xe5b   :  { %v1619_v11 = vmul.f32 %v1617_v10, %v1617_v10 }
 0xe5d   :  { %v1623_v34 = vsel %vm175_vm3, %v1619_v11, 0.0 }
 0xe5e   :  { %1624 = vadd.xlane.f32.xlu1 %v1623_v34 }
 0xec8   :  { %v1622_v35 = vpop.xlane.xlu2 %1621 }
 0xec9   :  { %v1626_v14 = vmul.f32 %v1622_v35, %v2325_v43  ;;  %v1790_v35 = vld [vmem:[#allocation2 + $0x2e8] sm:$0xff] }
 0xeca   :  { %1813 = vmatpush.msrb.mxu2 %v1790_v35 }
 0xecb   :  { %v1628_v15 = vadd.f32 1e-05, %v1626_v14  ;;  %v1789_v14 = vld [vmem:[#allocation2 + $0x2e0] sm:$0xff] }
 0xecc   :  { %1814 = vmatpush.msrb.mxu2 %v1789_v14 }
 0xecd   :  { %2079 = vrsqrt.f32 %v1628_v15  ;;  %vm1636_vm5 = vweird.f32 %v1628_v15 }
 0xed1   :  { %v1625_v1 = vpop.xlane.xlu1 %1624 }
 0xed2   :  { %v1627_v16 = vmul.f32 %v1625_v1, %v2325_v43  ;;  %v1832_v1 = vld [vmem:[#allocation2 + $0x338] sm:$0xff] }
 0xed3   :  { %v2080_v20 = vpop.eup %2079  ;;  %1849 = vmatpush.msra.mxu3 %v1832_v1 }
 0xed4   :  { %v1631_v2 = vmul.f32 %v2080_v20, %v1628_v15  ;;  %v1629_v22 = vadd.f32 1e-05, %v1627_v16  ;;  %vm1637_vm4 = vweird.f32 %v2080_v20  ;;  %v1788_v15 = vld [vmem:[#allocation2 + $0x2d8] sm:$0xff]  ;;  %v1831_v16 = vld [vmem:[#allocation2 + $0x330] sm:$0xff] }
 0xed5   :  { %vm1638_vm6 = vmor %vm1636_vm5, %vm1637_vm4  ;;  %1815 = vmatpush.msrb.mxu2 %v1788_v15  ;;  %1850 = vmatpush.msra.mxu3 %v1831_v16 }
 0xed6   :  { %v1632_v26 = vmul.f32 %v2080_v20, %v1631_v2  ;;  %2081 = vrsqrt.f32 %v1629_v22  ;;  %vm1646_vm10 = vweird.f32 %v1629_v22 }
 0xed7   :  { %1851 = vmatpush.msra.mxu3 %v1830_v21 }
 0xed8   :  { %v1633_v27 = vmul.f32 0.5, %v1632_v26 }
 0xeda   :  { %v1634_v28 = vsub.f32 1.5, %v1633_v27 }
 0xedc   :  { %v2082_v30 = vpop.eup %2081  ;;  %v1635_v4 = vmul.f32 %v2080_v20, %v1634_v28  ;;  %v1828_v28 = vld [vmem:[#allocation2 + $0x318] sm:$0xff] }
 0xedd   :  { %v1641_v25 = vmul.f32 %v2082_v30, %v1629_v22  ;;  %vm1647_vm9 = vweird.f32 %v2082_v30  ;;  %v1829_v22 = vld [vmem:[#allocation2 + $0x320] sm:$0xff] }
 0xede   :  { %v1639_v32 = vsel %vm1638_vm6, %v2080_v20, %v1635_v4  ;;  %vm1648_vm11 = vmor %vm1646_vm10, %vm1647_vm9  ;;  %1852 = vmatpush.msra.mxu3 %v1829_v22 }
 0xedf   :  { %v1650_v36 = vmul.f32 %v1639_v32, %v1616_v38  ;;  %v1642_v37 = vmul.f32 %v2082_v30, %v1641_v25 }
 0xee0   :  { %1853 = vmatpush.msra.mxu3 %v1828_v28 }
 0xee1   :  { %v1653_v42 = vmul.f32 %v1997_v31, %v1650_v36  ;;  %v1643_v55 = vmul.f32 0.5, %v1642_v37  ;;  %v2001_v36 = vld [vmem:[#allocation2 + $0x2c8] ss:$0 sm:$0xff] }
 0xee2   :  { %1854 = vmatpush.msra.mxu3 %v1827_v49 }
 0xee3   :  { %v1644_v63 = vsub.f32 1.5, %v1643_v55  ;;  %v1656_v3 = vadd.f32 %v1998_v40, %v1653_v42  ;;  %v2002_v55 = vld [vmem:[#allocation2 + $0x2d0] ss:$0 sm:$0xff] }
 0xee5   :  { %v1645_v5 = vmul.f32 %v2082_v30, %v1644_v63  ;;  %1936 = vmatmul.msk.f32.vlgmr.msra.gmra.mxu0 %vm175_vm3, %v1656_v3 }
 0xee7   :  { %v1649_v58 = vsel %vm1648_vm11, %v2082_v30, %v1645_v5 }
 0xee8   :  { %v1651_v44 = vmul.f32 %v1649_v58, %v1617_v10 }
 0xeea   :  { %v1654_v45 = vmul.f32 %v1997_v31, %v1651_v44 }
 0xeec   :  { %v1657_v46 = vadd.f32 %v1998_v40, %v1654_v45 }
 0xeee   :  { %1937 = vmatmul.msk.f32.gmra.mxu0 %vm175_vm3, %v1657_v46 }
 0xf62   :  { %v1687_v51 = vpop.f32.mrf.mxu0 }
 0xf63   :  { %v1688_v53 = vadd.f32 %v1999_v50, %v1687_v51  ;;  %v1825_v51 = vld [vmem:[#allocation2 + $0x300] sm:$0xff] }
 0xf65   :  { %v1693_v54 = vmax.f32 %v1688_v53, 0.0  ;;  %v2003_v53 = vld [vmem:[#allocation2 + $0x2f8] ss:$0 sm:$0xff] }
 0xf67   :  { %1938 = vmatmul.msk.f32.vlgmr.msra.gmra.mxu1 %vm135_vm2, %v1693_v54 }
 0xf6b   :  { %v1690_v56 = vpop.f32.mrf.mxu0 }
 0xf6c   :  { %v1691_v57 = vadd.f32 %v1999_v50, %v1690_v56  ;;  %v1826_v50 = vld [vmem:[#allocation2 + $0x308] sm:$0xff] }
 0xf6d   :  { %1855 = vmatpush.msra.mxu3 %v1826_v50 }
 0xf6e   :  { %v1694_v59 = vmax.f32 %v1691_v57, 0.0 }
 0xf6f   :  { %1856 = vmatpush.msra.mxu3 %v1825_v51 }
 0xf70   :  { %1939 = vmatmul.msk.f32.gmra.mxu1 %vm135_vm2, %v1694_v59 }
 0xfe4   :  { %v1728_v61 = vpop.f32.mrf.mxu1 }
 0xfe5   :  { %v1729_v62 = vadd.f32 %v2000_v60, %v1728_v61 }
 0xfe7   :  { %v1734_v0 = vadd.f32 %v1729_v62, %v1656_v3  ;;  %v2004_v62 = vld [vmem:[#allocation2 + $0x340] ss:$0 sm:$0xff] }
 0xfe9   :  { %v1738_v6 = vsel %vm175_vm3, %v1734_v0, 0.0 }
 0xfea   :  { %1739 = vadd.xlane.f32.xlu0 %v1738_v6 }
 0xfed   :  { %v1731_v52 = vpop.f32.mrf.mxu1 }
 0xfee   :  { %v1732_v7 = vadd.f32 %v2000_v60, %v1731_v52 }
 0xff0   :  { %v1735_v33 = vadd.f32 %v1732_v7, %v1657_v46 }
 0xff2   :  { %v1741_v38 = vsel %vm175_vm3, %v1735_v33, 0.0 }
 0xff3   :  { %1742 = vadd.xlane.f32.xlu2 %v1741_v38 }
0x105d   :  { %v1740_v8 = vpop.xlane.xlu0 %1739 }
0x105e   :  { %v1744_v9 = vmul.f32 %v1740_v8, %v2325_v43 }
0x1060   :  { %v1746_v41 = vsub.f32 %v1734_v0, %v1744_v9 }
0x1062   :  { %v1748_v24 = vmul.f32 %v1746_v41, %v1746_v41 }
0x1064   :  { %v1750_v10 = vsel %vm175_vm3, %v1748_v24, 0.0 }
0x1065   :  { %1751 = vadd.xlane.f32.xlu1 %v1750_v10 }
0x1066   :  { %v1743_v11 = vpop.xlane.xlu2 %1742 }
0x1067   :  { %v1745_v34 = vmul.f32 %v1743_v11, %v2325_v43 }
0x1069   :  { %v1747_v29 = vsub.f32 %v1735_v33, %v1745_v34 }
0x106b   :  { %v1749_v39 = vmul.f32 %v1747_v29, %v1747_v29 }
0x106d   :  { %v1753_v12 = vsel %vm175_vm3, %v1749_v39, 0.0 }
0x106e   :  { %1754 = vadd.xlane.f32.xlu0 %v1753_v12 }
0x10d8   :  { %v1752_v17 = vpop.xlane.xlu1 %1751 }
0x10d9   :  { %v1756_v18 = vmul.f32 %v1752_v17, %v2325_v43 }
0x10db   :  { %v1758_v19 = vadd.f32 1e-05, %v1756_v18 }
0x10dd   :  { %2083 = vrsqrt.f32 %v1758_v19  ;;  %vm1766_vm13 = vweird.f32 %v1758_v19 }
0x10e1   :  { %v1755_v20 = vpop.xlane.xlu0 %1754 }
0x10e2   :  { %v1757_v2 = vmul.f32 %v1755_v20, %v2325_v43 }
0x10e3   :  { %v2084_v23 = vpop.eup %2083 }
0x10e4   :  { %v1761_v26 = vmul.f32 %v2084_v23, %v1758_v19  ;;  %v1759_v27 = vadd.f32 1e-05, %v1757_v2  ;;  %vm1767_vm12 = vweird.f32 %v2084_v23 }
0x10e5   :  { %vm1768_vm14 = vmor %vm1766_vm13, %vm1767_vm12 }
0x10e6   :  { %v1762_v30 = vmul.f32 %v2084_v23, %v1761_v26  ;;  %2085 = vrsqrt.f32 %v1759_v27  ;;  %vm1776_vm0 = vweird.f32 %v1759_v27 }
0x10e8   :  { %v1763_v4 = vmul.f32 0.5, %v1762_v30 }
0x10ea   :  { %v1764_v31 = vsub.f32 1.5, %v1763_v4 }
0x10ec   :  { %v2086_v25 = vpop.eup %2085  ;;  %v1765_v32 = vmul.f32 %v2084_v23, %v1764_v31 }
0x10ed   :  { %v1771_v37 = vmul.f32 %v2086_v25, %v1759_v27  ;;  %vm1777_vm15 = vweird.f32 %v2086_v25 }
0x10ee   :  { %v1769_v43 = vsel %vm1768_vm14, %v2084_v23, %v1765_v32  ;;  %vm1778_vm1 = vmor %vm1776_vm0, %vm1777_vm15 }
0x10ef   :  { %v1780_v40 = vmul.f32 %v1769_v43, %v1746_v41  ;;  %v1772_v42 = vmul.f32 %v2086_v25, %v1771_v37 }
0x10f1   :  { %v1783_v63 = vmul.f32 %v2001_v36, %v1780_v40  ;;  %v1773_v3 = vmul.f32 0.5, %v1772_v42 }
0x10f3   :  { %v1774_v5 = vsub.f32 1.5, %v1773_v3  ;;  %v1786_v58 = vadd.f32 %v2002_v55, %v1783_v63 }
0x10f5   :  { %v1775_v44 = vmul.f32 %v2086_v25, %v1774_v5  ;;  %1940 = vmatmul.msk.f32.vlgmr.msrb.gmra.mxu2 %vm175_vm3, %v1786_v58 }
0x10f7   :  { %v1779_v45 = vsel %vm1778_vm1, %v2086_v25, %v1775_v44 }
0x10f8   :  { %v1781_v46 = vmul.f32 %v1779_v45, %v1747_v29 }
0x10fa   :  { %v1784_v47 = vmul.f32 %v2001_v36, %v1781_v46 }
0x10fc   :  { %v1787_v48 = vadd.f32 %v2002_v55, %v1784_v47 }
0x10fe   :  { %1941 = vmatmul.msk.f32.gmra.mxu2 %vm175_vm3, %v1787_v48 }
0x1178   :  { %v1817_v54 = vpop.f32.mrf.mxu2 }
0x1179   :  { %v1818_v56 = vadd.f32 %v2003_v53, %v1817_v54 }
0x117b   :  { %v1823_v57 = vmax.f32 %v1818_v56, 0.0 }
0x117d   :  { %1942 = vmatmul.msk.f32.vlgmr.msra.gmra.mxu3 %vm135_vm2, %v1823_v57 }
0x1181   :  { %v1820_v59 = vpop.f32.mrf.mxu2 }
0x1182   :  { %v1821_v60 = vadd.f32 %v2003_v53, %v1820_v59 }
0x1184   :  { %v1824_v61 = vmax.f32 %v1821_v60, 0.0 }
0x1186   :  { %1943 = vmatmul.msk.f32.gmra.mxu3 %vm135_vm2, %v1824_v61 }
0x1200   :  { %v1858_v0 = vpop.f32.mrf.mxu3 }
0x1201   :  { %v1859_v6 = vadd.f32 %v2004_v62, %v1858_v0 }
0x1203   :  { %1864 = vst [vmem:[%s2528_s4] sm:$0xff] %v1859_v6 }
0x1209   :  { %v1861_v52 = vpop.f32.mrf.mxu3 }
0x120a   :  { %v1862_v7 = vadd.f32 %v2004_v62, %v1861_v52 }
0x120c   :  { %1865 = vst [vmem:[%s2528_s4 + $0x8] sm:$0xff] %v1862_v7 }
0x120d   :  { %1870 = vsyncpa [#allocation3], 1 }

</bundles_post_ra>
